<compile_context>
chip_gen: v5e
topology: v5e:2x2
jax: 0.10.0
libtpu: 0.0.40
codegen_flags: <defaults>
</compile_context>

<pallas_src>
import functools

import jax
import jax.numpy as jnp
from jax.experimental import pallas as pl
from jax.experimental.pallas import tpu as pltpu

BATCH_ALIGN = 16  # bf16 rows pack 2-per-sublane -> keep batch tiles 16-aligned


def _round_up(x, m):
    return (x + m - 1) // m * m


def mlp_kernel(x_ref, w1_ref, b1_ref, w2_ref, b2_ref, w3_ref, b3_ref, o_ref):
    """Fused Linear->ReLU->Linear->ReLU->Linear on one batch tile.

    x arrives f32 and is cast to the weight dtype in-kernel; all matmuls
    accumulate in f32 on the MXU; biases are added in f32; intermediates live
    in vregs (never round-trip VMEM) and are cast back to the weight dtype so
    the next matmul takes the native MXU path.
    """
    x = x_ref[...].astype(w1_ref.dtype)
    h1 = jnp.dot(x, w1_ref[...], preferred_element_type=jnp.float32) + b1_ref[...]
    h1 = jnp.maximum(h1, 0.0).astype(w2_ref.dtype)                      # ReLU
    h2 = jnp.dot(h1, w2_ref[...], preferred_element_type=jnp.float32) + b2_ref[...]
    h2 = jnp.maximum(h2, 0.0).astype(w3_ref.dtype)                      # ReLU
    out = jnp.dot(h2, w3_ref[...], preferred_element_type=jnp.float32) + b3_ref[...]
    o_ref[...] = out.astype(o_ref.dtype)


def prepare_mlp_params(w1, b1, w2, b2, w3, b3, compute_dtype=jnp.bfloat16):
    """One-time parameter prep (hoisted out of the per-call path).

    Weights (stored (in_features, out_features)) are cast to the MXU compute
    dtype; biases stay f32 and are shaped (1, out_features) so they broadcast
    over the batch tile inside the kernel.
    """
    cw = lambda w: jnp.asarray(w, compute_dtype)
    cb = lambda v: jnp.asarray(v, jnp.float32).reshape(1, -1)
    return (cw(w1), cb(b1), cw(w2), cb(b2), cw(w3), cb(b3))


def _choose_schedule(batch, block_b=None):
    """Pick the batch tile and grid semantics for the current TPU generation.

    v5e/v6e have a single TensorCore, so the whole batch goes in one grid step
    (each extra step is ~0.35us of pure pipeline overhead).  v7x has two
    TensorCores, so keep two batch tiles and request a core-parallel split of
    the batch axis.
    """
    try:
        kind = jax.devices()[0].device_kind.lower()
    except Exception:
        kind = ""
    is_v7x = ("v7" in kind) or ("7x" in kind)

    b_aligned = _round_up(max(batch, BATCH_ALIGN), BATCH_ALIGN)
    if block_b is None:
        if is_v7x and b_aligned >= 2 * BATCH_ALIGN:
            block_b = _round_up(pl.cdiv(b_aligned, 2), BATCH_ALIGN)
        else:
            block_b = b_aligned
    block_b = _round_up(min(block_b, b_aligned), BATCH_ALIGN)

    n_steps = _round_up(batch, block_b) // block_b
    if n_steps == 1:
        semantics = "arbitrary"
    elif is_v7x and hasattr(pltpu, "CORE_PARALLEL"):
        semantics = "core_parallel"
    else:
        semantics = "parallel"
    return block_b, semantics


@functools.partial(jax.jit, static_argnames=("block_b", "semantics"))
def _mlp_forward(x, w1, b1, w2, b2, w3, b3, *, block_b, semantics):
    orig_dtype = x.dtype
    B, input_dim = x.shape
    hidden_dim = w1.shape[1]
    output_dim = w3.shape[1]

    # Only pad the batch dim (zero rows, sliced off by the caller); feature
    # dims are used at their true widths via full-array last-dim blocks.
    B_p = _round_up(B, block_b)
    if B_p != B:
        x = jnp.pad(x, ((0, B_p - B), (0, 0)))
    grid = (B_p // block_b,)

    sem_map = {
        "parallel": "parallel",
        "arbitrary": "arbitrary",
        "core_parallel": getattr(pltpu, "CORE_PARALLEL", "parallel"),
    }

    # Advisory cost estimate from the real (unpadded) problem size.
    wbytes = w1.dtype.itemsize
    flops = 2 * B * (input_dim * hidden_dim
                     + hidden_dim * hidden_dim
                     + hidden_dim * output_dim)
    bytes_accessed = (
        B * input_dim * x.dtype.itemsize                                # x
        + (input_dim * hidden_dim + hidden_dim * hidden_dim
           + hidden_dim * output_dim) * wbytes                          # weights
        + (2 * hidden_dim + output_dim) * 4                             # biases (f32)
        + B * output_dim * jnp.dtype(orig_dtype).itemsize)              # out

    return pl.pallas_call(
        mlp_kernel,
        out_shape=jax.ShapeDtypeStruct((B_p, output_dim), orig_dtype),
        grid_spec=pltpu.PrefetchScalarGridSpec(
            num_scalar_prefetch=0,
            grid=grid,
            in_specs=[
                pl.BlockSpec((block_b, input_dim), lambda i: (i, 0)),      # x tile
                pl.BlockSpec((input_dim, hidden_dim), lambda i: (0, 0)),   # W1 (resident)
                pl.BlockSpec((1, hidden_dim), lambda i: (0, 0)),           # b1
                pl.BlockSpec((hidden_dim, hidden_dim), lambda i: (0, 0)),  # W2 (resident)
                pl.BlockSpec((1, hidden_dim), lambda i: (0, 0)),           # b2
                pl.BlockSpec((hidden_dim, output_dim), lambda i: (0, 0)),  # W3 (resident)
                pl.BlockSpec((1, output_dim), lambda i: (0, 0)),           # b3
            ],
            out_specs=pl.BlockSpec((block_b, output_dim), lambda i: (i, 0)),
        ),
        compiler_params=pltpu.CompilerParams(
            dimension_semantics=(sem_map[semantics],),
        ),
        cost_estimate=pl.CostEstimate(
            flops=flops, transcendentals=0, bytes_accessed=bytes_accessed),
    )(x, w1, b1, w2, b2, w3, b3)


def mlp_pallas(x, params, block_b=None):
    """y = relu(x@W1+b1); y = relu(y@W2+b2); y = y@W3+b3  (single fused call)."""
    B = x.shape[0]
    block_b, semantics = _choose_schedule(B, block_b)
    try:
        out = _mlp_forward(x, *params, block_b=block_b, semantics=semantics)
        if semantics == "core_parallel":
            out = jax.block_until_ready(out)  # surface lowering issues -> fallback
    except Exception:
        if semantics != "parallel":
            out = _mlp_forward(x, *params, block_b=block_b, semantics="parallel")
        else:
            raise
    B_p = _round_up(B, block_b)
    return out[:B] if B_p != B else out


def init_linear(key, fan_in, fan_out):
    """PyTorch nn.Linear default init (uniform +-1/sqrt(fan_in)); W stored (in, out)."""
    kw, kb = jax.random.split(key)
    bound = 1.0 / jnp.sqrt(fan_in)
    w = jax.random.uniform(kw, (fan_in, fan_out), jnp.float32, -bound, bound)
    b = jax.random.uniform(kb, (1, fan_out), jnp.float32, -bound, bound)
    return w, b


def ref_mlp(x, w1, b1, w2, b2, w3, b3, dtype):
    """Pure-JAX reference with the same precision policy as the kernel."""
    c = lambda a: a.astype(dtype)
    h1 = jnp.maximum(jnp.dot(c(x), c(w1), preferred_element_type=jnp.float32) + b1, 0.0)
    h2 = jnp.maximum(jnp.dot(c(h1), c(w2), preferred_element_type=jnp.float32) + b2, 0.0)
    return jnp.dot(c(h2), c(w3), preferred_element_type=jnp.float32) + b3


if __name__ == "__main__":
    # Shapes consistent with the module's forward: x is (batch, input_dim).
    batch, input_dim, hidden_dim, output_dim = 512, 32, 64, 16

    key = jax.random.PRNGKey(0)
    kx, k1, k2, k3 = jax.random.split(key, 4)

    x = jax.random.normal(kx, (batch, input_dim), jnp.float32)
    w1, b1 = init_linear(k1, input_dim, hidden_dim)
    w2, b2 = init_linear(k2, hidden_dim, hidden_dim)
    w3, b3 = init_linear(k3, hidden_dim, output_dim)

    # One-time parameter prep (cast to bf16 / reshape biases), hoisted out of
    # the per-forward path.
    params = prepare_mlp_params(w1, b1, w2, b2, w3, b3)

    out = mlp_pallas(x, params)
    out = jax.block_until_ready(out)
    assert out.shape == (batch, output_dim)

    # Check against a reference using the same bf16-compute / f32-accumulate policy.
    ref_bf16 = ref_mlp(x, w1, b1, w2, b2, w3, b3, jnp.bfloat16)
    assert jnp.allclose(out, ref_bf16, atol=2e-2, rtol=2e-2), "mismatch vs bf16 reference"

    # Loose check against the full-f32 PyTorch-equivalent forward.
    ref_f32 = ref_mlp(x, w1, b1, w2, b2, w3, b3, jnp.float32)
    assert jnp.allclose(out, ref_f32, atol=5e-2, rtol=5e-2), "mismatch vs f32 reference"

    print("KERNEL_OK")
</pallas_src>

<mosaic_0001>
module attributes {stable_mosaic.version = 11 : i64} {
  func.func @mlp_kernel(%arg0: i32, %arg1: memref<512x32xf32, #tpu.memory_space<vmem>>, %arg2: memref<32x64xbf16, #tpu.memory_space<vmem>>, %arg3: memref<1x64xf32, #tpu.memory_space<vmem>>, %arg4: memref<64x64xbf16, #tpu.memory_space<vmem>>, %arg5: memref<1x64xf32, #tpu.memory_space<vmem>>, %arg6: memref<64x16xbf16, #tpu.memory_space<vmem>>, %arg7: memref<1x16xf32, #tpu.memory_space<vmem>>, %arg8: memref<512x16xf32, #tpu.memory_space<vmem>>) attributes {dimension_semantics = [#tpu.dimension_semantics<arbitrary>], iteration_bounds = array<i64: 1>, scalar_prefetch = 0 : i64, scratch_operands = 0 : i64, tpu.core_type = #tpu.core_type<tc>, window_params = [{transform_indices = @transform_0, window_bounds = array<i64: 512, 32>}, {pipeline_mode = #tpu.pipeline_mode<synchronous>, transform_indices = @transform_1, window_bounds = array<i64: 32, 64>}, {pipeline_mode = #tpu.pipeline_mode<synchronous>, transform_indices = @transform_2, window_bounds = array<i64: 1, 64>}, {pipeline_mode = #tpu.pipeline_mode<synchronous>, transform_indices = @transform_3, window_bounds = array<i64: 64, 64>}, {pipeline_mode = #tpu.pipeline_mode<synchronous>, transform_indices = @transform_4, window_bounds = array<i64: 1, 64>}, {pipeline_mode = #tpu.pipeline_mode<synchronous>, transform_indices = @transform_5, window_bounds = array<i64: 64, 16>}, {pipeline_mode = #tpu.pipeline_mode<synchronous>, transform_indices = @transform_6, window_bounds = array<i64: 1, 16>}, {transform_indices = @transform_7, window_bounds = array<i64: 512, 16>}]} {
    %c0 = arith.constant 0 : index
    %c0_0 = arith.constant 0 : index
    %0 = vector.load %arg1[%c0, %c0_0] : memref<512x32xf32, #tpu.memory_space<vmem>>, vector<512x32xf32>
    %1 = arith.truncf %0 : vector<512x32xf32> to vector<512x32xbf16>
    %c0_1 = arith.constant 0 : index
    %c0_2 = arith.constant 0 : index
    %2 = vector.load %arg2[%c0_1, %c0_2] : memref<32x64xbf16, #tpu.memory_space<vmem>>, vector<32x64xbf16>
    %cst = arith.constant dense<0.000000e+00> : vector<512x64xf32>
    %3 = tpu.matmul %1, %2, %cst {dimension_numbers = #tpu.dot_dimension_numbers<[1], [0], [0], [1], [0, 0, 1, 1], [], []>} : vector<512x32xbf16>, vector<32x64xbf16>, vector<512x64xf32> -> vector<512x64xf32>
    %c0_3 = arith.constant 0 : index
    %c0_4 = arith.constant 0 : index
    %4 = vector.load %arg3[%c0_3, %c0_4] : memref<1x64xf32, #tpu.memory_space<vmem>>, vector<1x64xf32>
    %5 = vector.broadcast %4 : vector<1x64xf32> to vector<512x64xf32>
    %6 = arith.addf %3, %5 : vector<512x64xf32>
    %cst_5 = arith.constant 0.000000e+00 : f32
    %7 = vector.broadcast %cst_5 : f32 to vector<512x64xf32>
    %8 = arith.maximumf %6, %7 : vector<512x64xf32>
    %9 = arith.truncf %8 : vector<512x64xf32> to vector<512x64xbf16>
    %c0_6 = arith.constant 0 : index
    %c0_7 = arith.constant 0 : index
    %10 = vector.load %arg4[%c0_6, %c0_7] : memref<64x64xbf16, #tpu.memory_space<vmem>>, vector<64x64xbf16>
    %cst_8 = arith.constant dense<0.000000e+00> : vector<512x64xf32>
    %11 = tpu.matmul %9, %10, %cst_8 {dimension_numbers = #tpu.dot_dimension_numbers<[1], [0], [0], [1], [0, 0, 1, 1], [], []>} : vector<512x64xbf16>, vector<64x64xbf16>, vector<512x64xf32> -> vector<512x64xf32>
    %c0_9 = arith.constant 0 : index
    %c0_10 = arith.constant 0 : index
    %12 = vector.load %arg5[%c0_9, %c0_10] : memref<1x64xf32, #tpu.memory_space<vmem>>, vector<1x64xf32>
    %13 = vector.broadcast %12 : vector<1x64xf32> to vector<512x64xf32>
    %14 = arith.addf %11, %13 : vector<512x64xf32>
    %cst_11 = arith.constant 0.000000e+00 : f32
    %15 = vector.broadcast %cst_11 : f32 to vector<512x64xf32>
    %16 = arith.maximumf %14, %15 : vector<512x64xf32>
    %17 = arith.truncf %16 : vector<512x64xf32> to vector<512x64xbf16>
    %c0_12 = arith.constant 0 : index
    %c0_13 = arith.constant 0 : index
    %18 = vector.load %arg6[%c0_12, %c0_13] : memref<64x16xbf16, #tpu.memory_space<vmem>>, vector<64x16xbf16>
    %cst_14 = arith.constant dense<0.000000e+00> : vector<512x16xf32>
    %19 = tpu.matmul %17, %18, %cst_14 {dimension_numbers = #tpu.dot_dimension_numbers<[1], [0], [0], [1], [0, 0, 1, 1], [], []>} : vector<512x64xbf16>, vector<64x16xbf16>, vector<512x16xf32> -> vector<512x16xf32>
    %c0_15 = arith.constant 0 : index
    %c0_16 = arith.constant 0 : index
    %20 = vector.load %arg7[%c0_15, %c0_16] : memref<1x16xf32, #tpu.memory_space<vmem>>, vector<1x16xf32>
    %21 = vector.broadcast %20 : vector<1x16xf32> to vector<512x16xf32>
    %22 = arith.addf %19, %21 : vector<512x16xf32>
    %c0_17 = arith.constant 0 : index
    %c0_18 = arith.constant 0 : index
    %23 = vector.load %arg8[%c0_17, %c0_18] : memref<512x16xf32, #tpu.memory_space<vmem>>, vector<512x16xf32>
    tpu.vector_store %arg8[%c0_17, %c0_18], %22 {strides = array<i32>} : memref<512x16xf32, #tpu.memory_space<vmem>>, vector<512x16xf32>,
    return
  }
  func.func @transform_0(%arg0: i32) -> (i32, i32) {
    %c0_i32 = arith.constant 0 : i32
    %c0_i32_0 = arith.constant 0 : i32
    return %arg0, %c0_i32 : i32, i32
  }
  func.func @transform_1(%arg0: i32) -> (i32, i32) {
    %c0_i32 = arith.constant 0 : i32
    %c0_i32_0 = arith.constant 0 : i32
    %c0_i32_1 = arith.constant 0 : i32
    return %c0_i32, %c0_i32_0 : i32, i32
  }
  func.func @transform_2(%arg0: i32) -> (i32, i32) {
    %c0_i32 = arith.constant 0 : i32
    %c0_i32_0 = arith.constant 0 : i32
    %c0_i32_1 = arith.constant 0 : i32
    return %c0_i32, %c0_i32_0 : i32, i32
  }
  func.func @transform_3(%arg0: i32) -> (i32, i32) {
    %c0_i32 = arith.constant 0 : i32
    %c0_i32_0 = arith.constant 0 : i32
    %c0_i32_1 = arith.constant 0 : i32
    return %c0_i32, %c0_i32_0 : i32, i32
  }
  func.func @transform_4(%arg0: i32) -> (i32, i32) {
    %c0_i32 = arith.constant 0 : i32
    %c0_i32_0 = arith.constant 0 : i32
    %c0_i32_1 = arith.constant 0 : i32
    return %c0_i32, %c0_i32_0 : i32, i32
  }
  func.func @transform_5(%arg0: i32) -> (i32, i32) {
    %c0_i32 = arith.constant 0 : i32
    %c0_i32_0 = arith.constant 0 : i32
    %c0_i32_1 = arith.constant 0 : i32
    return %c0_i32, %c0_i32_0 : i32, i32
  }
  func.func @transform_6(%arg0: i32) -> (i32, i32) {
    %c0_i32 = arith.constant 0 : i32
    %c0_i32_0 = arith.constant 0 : i32
    %c0_i32_1 = arith.constant 0 : i32
    return %c0_i32, %c0_i32_0 : i32, i32
  }
  func.func @transform_7(%arg0: i32) -> (i32, i32) {
    %c0_i32 = arith.constant 0 : i32
    %c0_i32_0 = arith.constant 0 : i32
    return %arg0, %c0_i32 : i32, i32
  }
}

module attributes {stable_mosaic.version = 11 : i64} {
  func.func @mlp_kernel(%arg0: i32, %arg1: memref<512x32xf32, #tpu.memory_space<vmem>>, %arg2: memref<32x64xbf16, #tpu.memory_space<vmem>>, %arg3: memref<1x64xf32, #tpu.memory_space<vmem>>, %arg4: memref<64x64xbf16, #tpu.memory_space<vmem>>, %arg5: memref<1x64xf32, #tpu.memory_space<vmem>>, %arg6: memref<64x16xbf16, #tpu.memory_space<vmem>>, %arg7: memref<1x16xf32, #tpu.memory_space<vmem>>, %arg8: memref<512x16xf32, #tpu.memory_space<vmem>>) attributes {dimension_semantics = [#tpu.dimension_semantics<parallel>], iteration_bounds = array<i64: 1>, scalar_prefetch = 0 : i64, scratch_operands = 0 : i64, tpu.core_type = #tpu.core_type<tc>, window_params = [{transform_indices = @transform_0, window_bounds = array<i64: 512, 32>}, {pipeline_mode = #tpu.pipeline_mode<synchronous>, transform_indices = @transform_1, window_bounds = array<i64: 32, 64>}, {pipeline_mode = #tpu.pipeline_mode<synchronous>, transform_indices = @transform_2, window_bounds = array<i64: 1, 64>}, {pipeline_mode = #tpu.pipeline_mode<synchronous>, transform_indices = @transform_3, window_bounds = array<i64: 64, 64>}, {pipeline_mode = #tpu.pipeline_mode<synchronous>, transform_indices = @transform_4, window_bounds = array<i64: 1, 64>}, {pipeline_mode = #tpu.pipeline_mode<synchronous>, transform_indices = @transform_5, window_bounds = array<i64: 64, 16>}, {pipeline_mode = #tpu.pipeline_mode<synchronous>, transform_indices = @transform_6, window_bounds = array<i64: 1, 16>}, {transform_indices = @transform_7, window_bounds = array<i64: 512, 16>}]} {
    %c0 = arith.constant 0 : index
    %c0_0 = arith.constant 0 : index
    %0 = vector.load %arg1[%c0, %c0_0] : memref<512x32xf32, #tpu.memory_space<vmem>>, vector<512x32xf32>
    %1 = arith.truncf %0 : vector<512x32xf32> to vector<512x32xbf16>
    %c0_1 = arith.constant 0 : index
    %c0_2 = arith.constant 0 : index
    %2 = vector.load %arg2[%c0_1, %c0_2] : memref<32x64xbf16, #tpu.memory_space<vmem>>, vector<32x64xbf16>
    %cst = arith.constant dense<0.000000e+00> : vector<512x64xf32>
    %3 = tpu.matmul %1, %2, %cst {dimension_numbers = #tpu.dot_dimension_numbers<[1], [0], [0], [1], [0, 0, 1, 1], [], []>} : vector<512x32xbf16>, vector<32x64xbf16>, vector<512x64xf32> -> vector<512x64xf32>
    %c0_3 = arith.constant 0 : index
    %c0_4 = arith.constant 0 : index
    %4 = vector.load %arg3[%c0_3, %c0_4] : memref<1x64xf32, #tpu.memory_space<vmem>>, vector<1x64xf32>
    %5 = vector.broadcast %4 : vector<1x64xf32> to vector<512x64xf32>
    %6 = arith.addf %3, %5 : vector<512x64xf32>
    %cst_5 = arith.constant 0.000000e+00 : f32
    %7 = vector.broadcast %cst_5 : f32 to vector<512x64xf32>
    %8 = arith.maximumf %6, %7 : vector<512x64xf32>
    %9 = arith.truncf %8 : vector<512x64xf32> to vector<512x64xbf16>
    %c0_6 = arith.constant 0 : index
    %c0_7 = arith.constant 0 : index
    %10 = vector.load %arg4[%c0_6, %c0_7] : memref<64x64xbf16, #tpu.memory_space<vmem>>, vector<64x64xbf16>
    %cst_8 = arith.constant dense<0.000000e+00> : vector<512x64xf32>
    %11 = tpu.matmul %9, %10, %cst_8 {dimension_numbers = #tpu.dot_dimension_numbers<[1], [0], [0], [1], [0, 0, 1, 1], [], []>} : vector<512x64xbf16>, vector<64x64xbf16>, vector<512x64xf32> -> vector<512x64xf32>
    %c0_9 = arith.constant 0 : index
    %c0_10 = arith.constant 0 : index
    %12 = vector.load %arg5[%c0_9, %c0_10] : memref<1x64xf32, #tpu.memory_space<vmem>>, vector<1x64xf32>
    %13 = vector.broadcast %12 : vector<1x64xf32> to vector<512x64xf32>
    %14 = arith.addf %11, %13 : vector<512x64xf32>
    %cst_11 = arith.constant 0.000000e+00 : f32
    %15 = vector.broadcast %cst_11 : f32 to vector<512x64xf32>
    %16 = arith.maximumf %14, %15 : vector<512x64xf32>
    %17 = arith.truncf %16 : vector<512x64xf32> to vector<512x64xbf16>
    %c0_12 = arith.constant 0 : index
    %c0_13 = arith.constant 0 : index
    %18 = vector.load %arg6[%c0_12, %c0_13] : memref<64x16xbf16, #tpu.memory_space<vmem>>, vector<64x16xbf16>
    %cst_14 = arith.constant dense<0.000000e+00> : vector<512x16xf32>
    %19 = tpu.matmul %17, %18, %cst_14 {dimension_numbers = #tpu.dot_dimension_numbers<[1], [0], [0], [1], [0, 0, 1, 1], [], []>} : vector<512x64xbf16>, vector<64x16xbf16>, vector<512x16xf32> -> vector<512x16xf32>
    %c0_15 = arith.constant 0 : index
    %c0_16 = arith.constant 0 : index
    %20 = vector.load %arg7[%c0_15, %c0_16] : memref<1x16xf32, #tpu.memory_space<vmem>>, vector<1x16xf32>
    %21 = vector.broadcast %20 : vector<1x16xf32> to vector<512x16xf32>
    %22 = arith.addf %19, %21 : vector<512x16xf32>
    %c0_17 = arith.constant 0 : index
    %c0_18 = arith.constant 0 : index
    %23 = vector.load %arg8[%c0_17, %c0_18] : memref<512x16xf32, #tpu.memory_space<vmem>>, vector<512x16xf32>
    tpu.vector_store %arg8[%c0_17, %c0_18], %22 {strides = array<i32>} : memref<512x16xf32, #tpu.memory_space<vmem>>, vector<512x16xf32>,
    return
  }
  func.func @transform_0(%arg0: i32) -> (i32, i32) {
    %c0_i32 = arith.constant 0 : i32
    %c0_i32_0 = arith.constant 0 : i32
    return %arg0, %c0_i32 : i32, i32
  }
  func.func @transform_1(%arg0: i32) -> (i32, i32) {
    %c0_i32 = arith.constant 0 : i32
    %c0_i32_0 = arith.constant 0 : i32
    %c0_i32_1 = arith.constant 0 : i32
    return %c0_i32, %c0_i32_0 : i32, i32
  }
  func.func @transform_2(%arg0: i32) -> (i32, i32) {
    %c0_i32 = arith.constant 0 : i32
    %c0_i32_0 = arith.constant 0 : i32
    %c0_i32_1 = arith.constant 0 : i32
    return %c0_i32, %c0_i32_0 : i32, i32
  }
  func.func @transform_3(%arg0: i32) -> (i32, i32) {
    %c0_i32 = arith.constant 0 : i32
    %c0_i32_0 = arith.constant 0 : i32
    %c0_i32_1 = arith.constant 0 : i32
    return %c0_i32, %c0_i32_0 : i32, i32
  }
  func.func @transform_4(%arg0: i32) -> (i32, i32) {
    %c0_i32 = arith.constant 0 : i32
    %c0_i32_0 = arith.constant 0 : i32
    %c0_i32_1 = arith.constant 0 : i32
    return %c0_i32, %c0_i32_0 : i32, i32
  }
  func.func @transform_5(%arg0: i32) -> (i32, i32) {
    %c0_i32 = arith.constant 0 : i32
    %c0_i32_0 = arith.constant 0 : i32
    %c0_i32_1 = arith.constant 0 : i32
    return %c0_i32, %c0_i32_0 : i32, i32
  }
  func.func @transform_6(%arg0: i32) -> (i32, i32) {
    %c0_i32 = arith.constant 0 : i32
    %c0_i32_0 = arith.constant 0 : i32
    %c0_i32_1 = arith.constant 0 : i32
    return %c0_i32, %c0_i32_0 : i32, i32
  }
  func.func @transform_7(%arg0: i32) -> (i32, i32) {
    %c0_i32 = arith.constant 0 : i32
    %c0_i32_0 = arith.constant 0 : i32
    return %arg0, %c0_i32 : i32, i32
  }
}

</mosaic_0001>

<bundles_post_ra>
// kernel: _mlp_forward.1
= control target key start
LH: loop header
LB: loop body
LE: loop exit
PB: predicated region body
PF: predicated region fallthrough
CT: control target
= control target key end

     0   :  { %vm143_vm0 = vcmask 261120   ;;  %vm541_vm1 = vcmask 523264   ;;  %vm1204_vm2 = vcmask 130048   ;;  %s2281_s1 = inlined_call_operand.vmem [shape: bf16[32,64], index: 1, kind: input, shape index: {}]   ;;  %s2282_s0 = inlined_call_operand.vmem [shape: f32[512,32], index: 0, kind: input, shape index: {}]   ;;  %s2283_s2 = inlined_call_operand.vmem [shape: f32[1,64], index: 2, kind: input, shape index: {}]   ;;  %s2284_s3 = inlined_call_operand.vmem [shape: bf16[64,64], index: 3, kind: input, shape index: {}]   ;;  %s2285_s4 = inlined_call_operand.vmem [shape: f32[1,64], index: 4, kind: input, shape index: {}]   ;;  %s2286_s5 = inlined_call_operand.vmem [shape: bf16[64,16], index: 5, kind: input, shape index: {}]   ;;  %s2287_s6 = inlined_call_operand.vmem [shape: f32[1,16], index: 6, kind: input, shape index: {}]   ;;  %s2288_s7 = inlined_call_operand.vmem [shape: f32[512,16], index: 7, kind: output, shape index: {}]  }
   0x1   :  { %v1410_v0 = vld [vmem:[%s2281_s1 + $0x8] sm:$0xff]  ;;  %v1409_v1 = vld [vmem:[%s2281_s1] sm:$0xff]  ;;  %v29_v5 = vld [vmem:[%s2282_s0 + $0x10] sm:$0xff] }
   0x2   :  { %246 = vmatpush.bf16.msra.mxu0 %v1410_v0  ;;  %v27_v2 = vld [vmem:[%s2282_s0] sm:$0xff]  ;;  %v28_v3 = vld [vmem:[%s2282_s0 + $0x8] sm:$0xff]  ;;  %1419 = vmatpush.bf16.msra.mxu3 %v1410_v0  ;;  %v30_v6 = vld [vmem:[%s2282_s0 + $0x18] sm:$0xff] }
   0x3   :  { %v91_v4 = vpack.c.bf16 %v28_v3, %v27_v2  ;;  %v92_v7 = vpack.c.bf16 %v30_v6, %v29_v5  ;;  %v31_v8 = vld [vmem:[%s2282_s0 + $0x20] sm:$0xff]  ;;  %v32_v9 = vld [vmem:[%s2282_s0 + $0x28] sm:$0xff]  ;;  %v33_v11 = vld [vmem:[%s2282_s0 + $0x30] sm:$0xff] }
   0x4   :  { %v93_v10 = vpack.c.bf16 %v32_v9, %v31_v8  ;;  %v34_v12 = vld [vmem:[%s2282_s0 + $0x38] sm:$0xff]  ;;  %v35_v14 = vld [vmem:[%s2282_s0 + $0x40] sm:$0xff]  ;;  %v36_v15 = vld [vmem:[%s2282_s0 + $0x48] sm:$0xff] }
   0x5   :  { %v94_v13 = vpack.c.bf16 %v34_v12, %v33_v11  ;;  %v95_v16 = vpack.c.bf16 %v36_v15, %v35_v14  ;;  %v37_v17 = vld [vmem:[%s2282_s0 + $0x50] sm:$0xff]  ;;  %v38_v18 = vld [vmem:[%s2282_s0 + $0x58] sm:$0xff]  ;;  %v39_v20 = vld [vmem:[%s2282_s0 + $0x60] sm:$0xff] }
   0x6   :  { %247 = vmatpush.bf16.msra.mxu0 %v1409_v1  ;;  %1420 = vmatpush.bf16.msra.mxu3 %v1409_v1  ;;  %v96_v19 = vpack.c.bf16 %v38_v18, %v37_v17  ;;  %v40_v21 = vld [vmem:[%s2282_s0 + $0x68] sm:$0xff]  ;;  %v1414_v22 = vld [vmem:[%s2284_s3 + $0x18] sm:$0xff]  ;;  %v1413_v24 = vld [vmem:[%s2284_s3 + $0x10] sm:$0xff] }
   0x7   :  { %v97_v23 = vpack.c.bf16 %v40_v21, %v39_v20  ;;  %642 = vmatpush.bf16.msra.mxu1 %v1414_v22  ;;  %v1412_v25 = vld [vmem:[%s2284_s3 + $0x8] sm:$0xff]  ;;  %v1411_v26 = vld [vmem:[%s2284_s3] sm:$0xff]  ;;  %v41_v27 = vld [vmem:[%s2282_s0 + $0x70] sm:$0xff] }
   0x8   :  { %v42_v28 = vld [vmem:[%s2282_s0 + $0x78] sm:$0xff]  ;;  %v43_v30 = vld [vmem:[%s2282_s0 + $0x80] sm:$0xff]  ;;  %v44_v31 = vld [vmem:[%s2282_s0 + $0x88] sm:$0xff] }
   0x9   :  { %1281 = vmatmul.msk.bf16.vlgmr.msra.gmra.mxu0 %vm143_vm0, %v91_v4  ;;  %v98_v29 = vpack.c.bf16 %v42_v28, %v41_v27  ;;  %v99_v32 = vpack.c.bf16 %v44_v31, %v43_v30  ;;  %v1557_v34 = vld [vmem:[%s2283_s2] ss:$0 sm:$0xff]  ;;  %v45_v40 = vld [vmem:[%s2282_s0 + $0x90] sm:$0xff]  ;;  %v46_v41 = vld [vmem:[%s2282_s0 + $0x98] sm:$0xff] }
   0xa   :  { %1421 = vmatpush.bf16.msrb.mxu3 %v1414_v22  ;;  %v100_v43 = vpack.c.bf16 %v46_v41, %v45_v40  ;;  %v47_v50 = vld [vmem:[%s2282_s0 + $0xa0] sm:$0xff]  ;;  %v48_v51 = vld [vmem:[%s2282_s0 + $0xa8] sm:$0xff]  ;;  %v49_v60 = vld [vmem:[%s2282_s0 + $0xb0] sm:$0xff] }
   0xb   :  { %643 = vmatpush.bf16.msra.mxu1 %v1413_v24  ;;  %v101_v53 = vpack.c.bf16 %v48_v51, %v47_v50  ;;  %v50_v61 = vld [vmem:[%s2282_s0 + $0xb8] sm:$0xff]  ;;  %v51_v6 = vld [vmem:[%s2282_s0 + $0xc0] sm:$0xff]  ;;  %v56_v27 = vld [vmem:[%s2282_s0 + $0xe8] sm:$0xff] }
   0xc   :  { %v102_v63 = vpack.c.bf16 %v50_v61, %v49_v60  ;;  %v54_v17 = vld [vmem:[%s2282_s0 + $0xd8] sm:$0xff]  ;;  %v1637_v41 = vld [vmem:[%s2286_s5 + $0x10] sm:$0xff]  ;;  %v59_v51 = vld [vmem:[%s2282_s0 + $0x100] sm:$0xff] }
   0xe   :  { %1422 = vmatpush.bf16.msrb.mxu3 %v1413_v24 }
   0xf   :  { %644 = vmatpush.bf16.msra.mxu1 %v1412_v25 }
  0x12   :  { %1423 = vmatpush.bf16.msrb.mxu3 %v1412_v25 }
  0x13   :  { %645 = vmatpush.bf16.msra.mxu1 %v1411_v26 }
  0x16   :  { %1424 = vmatpush.bf16.msrb.mxu3 %v1411_v26  ;;  %v55_v26 = vld [vmem:[%s2282_s0 + $0xe0] sm:$0xff] }
  0x19   :  { %1282 = vmatmul.msk.bf16.gmra.mxu0 %vm143_vm0, %v92_v7  ;;  %v52_v7 = vld [vmem:[%s2282_s0 + $0xc8] sm:$0xff] }
  0x1a   :  { %v103_v9 = vpack.c.bf16 %v52_v7, %v51_v6 }
  0x29   :  { %1283 = vmatmul.msk.bf16.gmra.mxu0 %vm143_vm0, %v93_v10 }
  0x39   :  { %1284 = vmatmul.msk.bf16.gmra.mxu0 %vm143_vm0, %v94_v13 }
  0x49   :  { %1285 = vmatmul.msk.bf16.gmra.mxu0 %vm143_vm0, %v95_v16  ;;  %v53_v16 = vld [vmem:[%s2282_s0 + $0xd0] sm:$0xff] }
  0x59   :  { %1286 = vmatmul.msk.bf16.gmra.mxu0 %vm143_vm0, %v96_v19  ;;  %v104_v19 = vpack.c.bf16 %v54_v17, %v53_v16  ;;  %v63_v16 = vld [vmem:[%s2282_s0 + $0x120] sm:$0xff]  ;;  %v64_v17 = vld [vmem:[%s2282_s0 + $0x128] sm:$0xff] }
  0x69   :  { %1287 = vmatmul.msk.bf16.gmra.mxu0 %vm143_vm0, %v97_v23 }
  0x79   :  { %1288 = vmatmul.msk.bf16.gmra.mxu0 %vm143_vm0, %v98_v29  ;;  %v105_v29 = vpack.c.bf16 %v56_v27, %v55_v26 }
  0x86   :  { %v249_v33 = vpop.f32.mrf.mxu0 }
  0x87   :  { %v250_v35 = vadd.f32 %v1557_v34, %v249_v33 }
  0x89   :  { %1289 = vmatmul.msk.bf16.gmra.mxu0 %vm143_vm0, %v99_v32  ;;  %v409_v38 = vmax.f32 %v250_v35, 0.0  ;;  %v1625_v35 = vld [vmem:[%s2286_s5 + $0x18] sm:$0xff] }
  0x8a   :  { %1039 = vmatpush.bf16.msra.mxu2 %v1625_v35 }
  0x8e   :  { %v251_v36 = vpop.f32.mrf.mxu0  ;;  %1040 = vmatpush.bf16.msra.mxu2 %v1637_v41 }
  0x8f   :  { %v252_v37 = vadd.f32 %v1557_v34, %v251_v36 }
  0x91   :  { %v410_v39 = vmax.f32 %v252_v37, 0.0 }
  0x93   :  { %v473_v42 = vpack.c.bf16 %v410_v39, %v409_v38  ;;  %v57_v38 = vld [vmem:[%s2282_s0 + $0xf0] sm:$0xff]  ;;  %v58_v39 = vld [vmem:[%s2282_s0 + $0xf8] sm:$0xff] }
  0x95   :  { %1329 = vmatmul.msk.bf16.vlgmr.msra.gmra.mxu1 %vm541_vm1, %v473_v42  ;;  %v106_v42 = vpack.c.bf16 %v58_v39, %v57_v38 }
  0x96   :  { %v254_v44 = vpop.f32.mrf.mxu0 }
  0x97   :  { %v255_v45 = vadd.f32 %v1557_v34, %v254_v44  ;;  %v1644_v44 = vld [vmem:[%s2286_s5 + $0x8] sm:$0xff] }
  0x98   :  { %1041 = vmatpush.bf16.msra.mxu2 %v1644_v44 }
  0x99   :  { %1290 = vmatmul.msk.bf16.gmra.mxu0 %vm143_vm0, %v100_v43  ;;  %v411_v48 = vmax.f32 %v255_v45, 0.0  ;;  %v1651_v45 = vld [vmem:[%s2286_s5] sm:$0xff] }
  0x9c   :  { %1042 = vmatpush.bf16.msra.mxu2 %v1651_v45 }
  0x9e   :  { %v256_v46 = vpop.f32.mrf.mxu0 }
  0x9f   :  { %v257_v47 = vadd.f32 %v1557_v34, %v256_v46 }
  0xa1   :  { %v412_v49 = vmax.f32 %v257_v47, 0.0 }
  0xa3   :  { %v474_v52 = vpack.c.bf16 %v412_v49, %v411_v48 }
  0xa5   :  { %1330 = vmatmul.msk.bf16.gmra.mxu1 %vm541_vm1, %v474_v52  ;;  %v60_v52 = vld [vmem:[%s2282_s0 + $0x108] sm:$0xff] }
  0xa6   :  { %v259_v54 = vpop.f32.mrf.mxu0 }
  0xa7   :  { %v260_v55 = vadd.f32 %v1557_v34, %v259_v54  ;;  %v107_v54 = vpack.c.bf16 %v60_v52, %v59_v51 }
  0xa9   :  { %1291 = vmatmul.msk.bf16.gmra.mxu0 %vm143_vm0, %v101_v53  ;;  %v413_v58 = vmax.f32 %v260_v55, 0.0 }
  0xae   :  { %v261_v56 = vpop.f32.mrf.mxu0 }
  0xaf   :  { %v262_v57 = vadd.f32 %v1557_v34, %v261_v56 }
  0xb1   :  { %v414_v59 = vmax.f32 %v262_v57, 0.0 }
  0xb3   :  { %v475_v62 = vpack.c.bf16 %v414_v59, %v413_v58 }
  0xb5   :  { %1331 = vmatmul.msk.bf16.gmra.mxu1 %vm541_vm1, %v475_v62  ;;  %v61_v62 = vld [vmem:[%s2282_s0 + $0x110] sm:$0xff] }
  0xb6   :  { %v264_v0 = vpop.f32.mrf.mxu0 }
  0xb7   :  { %v265_v1 = vadd.f32 %v1557_v34, %v264_v0 }
  0xb9   :  { %1292 = vmatmul.msk.bf16.gmra.mxu0 %vm143_vm0, %v102_v63  ;;  %v415_v4 = vmax.f32 %v265_v1, 0.0  ;;  %v62_v63 = vld [vmem:[%s2282_s0 + $0x118] sm:$0xff]  ;;  %v1675_v1 = vld [vmem:[%s2285_s4] ss:$0 sm:$0xff] }
  0xbe   :  { %v266_v2 = vpop.f32.mrf.mxu0 }
  0xbf   :  { %v267_v3 = vadd.f32 %v1557_v34, %v266_v2  ;;  %v108_v2 = vpack.c.bf16 %v62_v63, %v61_v62 }
  0xc1   :  { %v416_v5 = vmax.f32 %v267_v3, 0.0 }
  0xc3   :  { %v476_v8 = vpack.c.bf16 %v416_v5, %v415_v4 }
  0xc5   :  { %1332 = vmatmul.msk.bf16.gmra.mxu1 %vm541_vm1, %v476_v8 }
  0xc6   :  { %v269_v10 = vpop.f32.mrf.mxu0 }
  0xc7   :  { %v270_v11 = vadd.f32 %v1557_v34, %v269_v10 }
  0xc9   :  { %1293 = vmatmul.msk.bf16.gmra.mxu0 %vm143_vm0, %v103_v9  ;;  %v417_v14 = vmax.f32 %v270_v11, 0.0 }
  0xce   :  { %v271_v12 = vpop.f32.mrf.mxu0 }
  0xcf   :  { %v272_v13 = vadd.f32 %v1557_v34, %v271_v12 }
  0xd1   :  { %v418_v15 = vmax.f32 %v272_v13, 0.0 }
  0xd3   :  { %v477_v18 = vpack.c.bf16 %v418_v15, %v417_v14 }
  0xd5   :  { %1333 = vmatmul.msk.bf16.gmra.mxu1 %vm541_vm1, %v477_v18 }
  0xd6   :  { %v274_v20 = vpop.f32.mrf.mxu0 }
  0xd7   :  { %v275_v21 = vadd.f32 %v1557_v34, %v274_v20 }
  0xd9   :  { %1294 = vmatmul.msk.bf16.gmra.mxu0 %vm143_vm0, %v104_v19  ;;  %v419_v24 = vmax.f32 %v275_v21, 0.0  ;;  %v109_v19 = vpack.c.bf16 %v64_v17, %v63_v16 }
  0xde   :  { %v276_v22 = vpop.f32.mrf.mxu0 }
  0xdf   :  { %v277_v23 = vadd.f32 %v1557_v34, %v276_v22 }
  0xe1   :  { %v420_v25 = vmax.f32 %v277_v23, 0.0 }
  0xe3   :  { %v478_v28 = vpack.c.bf16 %v420_v25, %v419_v24 }
  0xe5   :  { %1334 = vmatmul.msk.bf16.gmra.mxu1 %vm541_vm1, %v478_v28 }
  0xe6   :  { %v279_v30 = vpop.f32.mrf.mxu0 }
  0xe7   :  { %v280_v31 = vadd.f32 %v1557_v34, %v279_v30 }
  0xe9   :  { %1295 = vmatmul.msk.bf16.gmra.mxu0 %vm143_vm0, %v105_v29  ;;  %v421_v36 = vmax.f32 %v280_v31, 0.0 }
  0xee   :  { %v281_v32 = vpop.f32.mrf.mxu0 }
  0xef   :  { %v282_v33 = vadd.f32 %v1557_v34, %v281_v32 }
  0xf1   :  { %v422_v37 = vmax.f32 %v282_v33, 0.0  ;;  %v65_v33 = vld [vmem:[%s2282_s0 + $0x130] sm:$0xff] }
  0xf3   :  { %v479_v40 = vpack.c.bf16 %v422_v37, %v421_v36  ;;  %v66_v36 = vld [vmem:[%s2282_s0 + $0x138] sm:$0xff] }
  0xf4   :  { %v110_v38 = vpack.c.bf16 %v66_v36, %v65_v33 }
  0xf5   :  { %1335 = vmatmul.msk.bf16.gmra.mxu1 %vm541_vm1, %v479_v40 }
  0xf6   :  { %v284_v43 = vpop.f32.mrf.mxu0 }
  0xf7   :  { %v285_v46 = vadd.f32 %v1557_v34, %v284_v43 }
  0xf9   :  { %1296 = vmatmul.msk.bf16.gmra.mxu0 %vm143_vm0, %v106_v42  ;;  %v423_v49 = vmax.f32 %v285_v46, 0.0 }
  0xfe   :  { %v286_v47 = vpop.f32.mrf.mxu0 }
  0xff   :  { %v287_v48 = vadd.f32 %v1557_v34, %v286_v47 }
 0x101   :  { %v424_v50 = vmax.f32 %v287_v48, 0.0 }
 0x103   :  { %v480_v53 = vpack.c.bf16 %v424_v50, %v423_v49 }
 0x105   :  { %1336 = vmatmul.msk.bf16.gmra.mxu1 %vm541_vm1, %v480_v53 }
 0x106   :  { %v289_v55 = vpop.f32.mrf.mxu0 }
 0x107   :  { %v290_v56 = vadd.f32 %v1557_v34, %v289_v55  ;;  %v67_v55 = vld [vmem:[%s2282_s0 + $0x140] sm:$0xff] }
 0x109   :  { %1297 = vmatmul.msk.bf16.gmra.mxu0 %vm143_vm0, %v107_v54  ;;  %v425_v59 = vmax.f32 %v290_v56, 0.0  ;;  %v68_v56 = vld [vmem:[%s2282_s0 + $0x148] sm:$0xff] }
 0x10e   :  { %v291_v57 = vpop.f32.mrf.mxu0 }
 0x10f   :  { %v292_v58 = vadd.f32 %v1557_v34, %v291_v57 }
 0x111   :  { %v426_v60 = vmax.f32 %v292_v58, 0.0  ;;  %v111_v58 = vpack.c.bf16 %v68_v56, %v67_v55  ;;  %v80_v55 = vld [vmem:[%s2282_s0 + $0x1a8] sm:$0xff] }
 0x112   :  { %v647_v61 = vpop.f32.mrf.mxu1 }
 0x113   :  { %v481_v0 = vpack.c.bf16 %v426_v60, %v425_v59  ;;  %v648_v4 = vadd.f32 %v1675_v1, %v647_v61 }
 0x115   :  { %1337 = vmatmul.msk.bf16.gmra.mxu1 %vm541_vm1, %v481_v0  ;;  %v807_v7 = vmax.f32 %v648_v4, 0.0 }
 0x116   :  { %v294_v3 = vpop.f32.mrf.mxu0 }
 0x117   :  { %v295_v8 = vadd.f32 %v1557_v34, %v294_v3 }
 0x119   :  { %1298 = vmatmul.msk.bf16.gmra.mxu0 %vm143_vm0, %v108_v2  ;;  %v427_v13 = vmax.f32 %v295_v8, 0.0 }
 0x11a   :  { %v649_v5 = vpop.f32.mrf.mxu1 }
 0x11b   :  { %v650_v6 = vadd.f32 %v1675_v1, %v649_v5 }
 0x11d   :  { %v808_v9 = vmax.f32 %v650_v6, 0.0 }
 0x11e   :  { %v296_v10 = vpop.f32.mrf.mxu0 }
 0x11f   :  { %v297_v11 = vadd.f32 %v1557_v34, %v296_v10  ;;  %v871_v12 = vpack.c.bf16 %v808_v9, %v807_v7  ;;  %v69_v9 = vld [vmem:[%s2282_s0 + $0x150] sm:$0xff]  ;;  %v70_v10 = vld [vmem:[%s2282_s0 + $0x158] sm:$0xff] }
 0x121   :  { %v428_v14 = vmax.f32 %v297_v11, 0.0  ;;  %1377 = vmatmul.msk.bf16.vlgmr.msra.gmra.mxu2 %vm541_vm1, %v871_v12  ;;  %v112_v12 = vpack.c.bf16 %v70_v10, %v69_v9  ;;  %v81_v9 = vld [vmem:[%s2282_s0 + $0x1b0] sm:$0xff]  ;;  %v82_v10 = vld [vmem:[%s2282_s0 + $0x1b8] sm:$0xff] }
 0x122   :  { %v652_v15 = vpop.f32.mrf.mxu1 }
 0x123   :  { %v482_v18 = vpack.c.bf16 %v428_v14, %v427_v13  ;;  %v653_v21 = vadd.f32 %v1675_v1, %v652_v15 }
 0x125   :  { %1338 = vmatmul.msk.bf16.gmra.mxu1 %vm541_vm1, %v482_v18  ;;  %v809_v24 = vmax.f32 %v653_v21, 0.0 }
 0x126   :  { %v299_v20 = vpop.f32.mrf.mxu0 }
 0x127   :  { %v300_v25 = vadd.f32 %v1557_v34, %v299_v20 }
 0x129   :  { %1299 = vmatmul.msk.bf16.gmra.mxu0 %vm143_vm0, %v109_v19  ;;  %v429_v30 = vmax.f32 %v300_v25, 0.0 }
 0x12a   :  { %v654_v22 = vpop.f32.mrf.mxu1 }
 0x12b   :  { %v655_v23 = vadd.f32 %v1675_v1, %v654_v22 }
 0x12d   :  { %v810_v26 = vmax.f32 %v655_v23, 0.0 }
 0x12e   :  { %v301_v27 = vpop.f32.mrf.mxu0 }
 0x12f   :  { %v302_v28 = vadd.f32 %v1557_v34, %v301_v27  ;;  %v872_v29 = vpack.c.bf16 %v810_v26, %v809_v24  ;;  %v71_v26 = vld [vmem:[%s2282_s0 + $0x160] sm:$0xff]  ;;  %v72_v27 = vld [vmem:[%s2282_s0 + $0x168] sm:$0xff] }
 0x131   :  { %v430_v31 = vmax.f32 %v302_v28, 0.0  ;;  %1378 = vmatmul.msk.bf16.gmra.mxu2 %vm541_vm1, %v872_v29  ;;  %v113_v29 = vpack.c.bf16 %v72_v27, %v71_v26  ;;  %v83_v26 = vld [vmem:[%s2282_s0 + $0x1c0] sm:$0xff]  ;;  %v84_v27 = vld [vmem:[%s2282_s0 + $0x1c8] sm:$0xff] }
 0x132   :  { %v657_v32 = vpop.f32.mrf.mxu1 }
 0x133   :  { %v483_v37 = vpack.c.bf16 %v430_v31, %v429_v30  ;;  %v658_v40 = vadd.f32 %v1675_v1, %v657_v32  ;;  %v77_v31 = vld [vmem:[%s2282_s0 + $0x190] sm:$0xff]  ;;  %v78_v32 = vld [vmem:[%s2282_s0 + $0x198] sm:$0xff] }
 0x134   :  { %v116_v36 = vpack.c.bf16 %v78_v32, %v77_v31 }
 0x135   :  { %1339 = vmatmul.msk.bf16.gmra.mxu1 %vm541_vm1, %v483_v37  ;;  %v811_v46 = vmax.f32 %v658_v40, 0.0 }
 0x136   :  { %v304_v39 = vpop.f32.mrf.mxu0  ;;  %1306 = vmatmul.msk.bf16.vlgmr.msra.gmra.mxu3 %vm143_vm0, %v116_v36 }
 0x137   :  { %v305_v47 = vadd.f32 %v1557_v34, %v304_v39  ;;  %1425 = vmatpush.bf16.msra.mxu3 %v1625_v35  ;;  %v74_v35 = vld [vmem:[%s2282_s0 + $0x178] sm:$0xff] }
 0x139   :  { %1300 = vmatmul.msk.bf16.gmra.mxu0 %vm143_vm0, %v110_v38  ;;  %v431_v52 = vmax.f32 %v305_v47, 0.0 }
 0x13a   :  { %v659_v42 = vpop.f32.mrf.mxu1 }
 0x13b   :  { %v660_v43 = vadd.f32 %v1675_v1, %v659_v42  ;;  %1426 = vmatpush.bf16.msra.mxu3 %v1637_v41 }
 0x13d   :  { %v812_v48 = vmax.f32 %v660_v43, 0.0 }
 0x13e   :  { %v306_v49 = vpop.f32.mrf.mxu0 }
 0x13f   :  { %v307_v50 = vadd.f32 %v1557_v34, %v306_v49  ;;  %v873_v51 = vpack.c.bf16 %v812_v48, %v811_v46  ;;  %1427 = vmatpush.bf16.msra.mxu3 %v1644_v44 }
 0x141   :  { %v432_v53 = vmax.f32 %v307_v50, 0.0  ;;  %1379 = vmatmul.msk.bf16.gmra.mxu2 %vm541_vm1, %v873_v51  ;;  %v73_v51 = vld [vmem:[%s2282_s0 + $0x170] sm:$0xff] }
 0x142   :  { %v662_v54 = vpop.f32.mrf.mxu1 }
 0x143   :  { %v484_v57 = vpack.c.bf16 %v432_v53, %v431_v52  ;;  %v663_v60 = vadd.f32 %v1675_v1, %v662_v54  ;;  %v114_v53 = vpack.c.bf16 %v74_v35, %v73_v51  ;;  %v79_v54 = vld [vmem:[%s2282_s0 + $0x1a0] sm:$0xff]  ;;  %1428 = vmatpush.bf16.msra.mxu3 %v1651_v45  ;;  %v85_v51 = vld [vmem:[%s2282_s0 + $0x1d0] sm:$0xff]  ;;  %v86_v35 = vld [vmem:[%s2282_s0 + $0x1d8] sm:$0xff] }
 0x145   :  { %1340 = vmatmul.msk.bf16.gmra.mxu1 %vm541_vm1, %v484_v57  ;;  %v813_v63 = vmax.f32 %v663_v60, 0.0  ;;  %v117_v57 = vpack.c.bf16 %v80_v55, %v79_v54 }
 0x146   :  { %v309_v59 = vpop.f32.mrf.mxu0 }
 0x147   :  { %v310_v0 = vadd.f32 %v1557_v34, %v309_v59  ;;  %1307 = vmatmul.msk.bf16.gmra.mxu3 %vm143_vm0, %v117_v57 }
 0x149   :  { %1301 = vmatmul.msk.bf16.gmra.mxu0 %vm143_vm0, %v111_v58  ;;  %v433_v6 = vmax.f32 %v310_v0, 0.0 }
 0x14a   :  { %v664_v61 = vpop.f32.mrf.mxu1 }
 0x14b   :  { %v665_v62 = vadd.f32 %v1675_v1, %v664_v61 }
 0x14d   :  { %v814_v2 = vmax.f32 %v665_v62, 0.0 }
 0x14e   :  { %v311_v3 = vpop.f32.mrf.mxu0 }
 0x14f   :  { %v312_v4 = vadd.f32 %v1557_v34, %v311_v3  ;;  %v874_v5 = vpack.c.bf16 %v814_v2, %v813_v63 }
 0x151   :  { %v434_v7 = vmax.f32 %v312_v4, 0.0  ;;  %1380 = vmatmul.msk.bf16.gmra.mxu2 %vm541_vm1, %v874_v5  ;;  %v75_v4 = vld [vmem:[%s2282_s0 + $0x180] sm:$0xff]  ;;  %v76_v5 = vld [vmem:[%s2282_s0 + $0x188] sm:$0xff] }
 0x152   :  { %v667_v8 = vpop.f32.mrf.mxu1 }
 0x153   :  { %v485_v11 = vpack.c.bf16 %v434_v7, %v433_v6  ;;  %v668_v14 = vadd.f32 %v1675_v1, %v667_v8  ;;  %v115_v7 = vpack.c.bf16 %v76_v5, %v75_v4  ;;  %v87_v5 = vld [vmem:[%s2282_s0 + $0x1e0] sm:$0xff] }
 0x155   :  { %1341 = vmatmul.msk.bf16.gmra.mxu1 %vm541_vm1, %v485_v11  ;;  %v815_v17 = vmax.f32 %v668_v14, 0.0 }
 0x156   :  { %v314_v13 = vpop.f32.mrf.mxu0 }
 0x157   :  { %v315_v18 = vadd.f32 %v1557_v34, %v314_v13 }
 0x159   :  { %1302 = vmatmul.msk.bf16.gmra.mxu0 %vm143_vm0, %v112_v12  ;;  %v435_v23 = vmax.f32 %v315_v18, 0.0  ;;  %v118_v12 = vpack.c.bf16 %v82_v10, %v81_v9 }
 0x15a   :  { %v669_v15 = vpop.f32.mrf.mxu1 }
 0x15b   :  { %v670_v16 = vadd.f32 %v1675_v1, %v669_v15  ;;  %1308 = vmatmul.msk.bf16.gmra.mxu3 %vm143_vm0, %v118_v12 }
 0x15d   :  { %v816_v19 = vmax.f32 %v670_v16, 0.0 }
 0x15e   :  { %v316_v20 = vpop.f32.mrf.mxu0 }
 0x15f   :  { %v317_v21 = vadd.f32 %v1557_v34, %v316_v20  ;;  %v875_v22 = vpack.c.bf16 %v816_v19, %v815_v17 }
 0x161   :  { %v436_v24 = vmax.f32 %v317_v21, 0.0  ;;  %1381 = vmatmul.msk.bf16.gmra.mxu2 %vm541_vm1, %v875_v22 }
 0x162   :  { %v672_v25 = vpop.f32.mrf.mxu1 }
 0x163   :  { %v486_v28 = vpack.c.bf16 %v436_v24, %v435_v23  ;;  %v673_v33 = vadd.f32 %v1675_v1, %v672_v25 }
 0x165   :  { %1342 = vmatmul.msk.bf16.gmra.mxu1 %vm541_vm1, %v486_v28  ;;  %v817_v39 = vmax.f32 %v673_v33, 0.0 }
 0x166   :  { %v319_v30 = vpop.f32.mrf.mxu0 }
 0x167   :  { %v320_v40 = vadd.f32 %v1557_v34, %v319_v30 }
 0x169   :  { %1303 = vmatmul.msk.bf16.gmra.mxu0 %vm143_vm0, %v113_v29  ;;  %v437_v48 = vmax.f32 %v320_v40, 0.0  ;;  %v119_v29 = vpack.c.bf16 %v84_v27, %v83_v26  ;;  %v89_v26 = vld [vmem:[%s2282_s0 + $0x1f0] sm:$0xff]  ;;  %v90_v27 = vld [vmem:[%s2282_s0 + $0x1f8] sm:$0xff] }
 0x16a   :  { %v674_v37 = vpop.f32.mrf.mxu1 }
 0x16b   :  { %v675_v38 = vadd.f32 %v1675_v1, %v674_v37  ;;  %1309 = vmatmul.msk.bf16.gmra.mxu3 %vm143_vm0, %v119_v29  ;;  %v122_v29 = vpack.c.bf16 %v90_v27, %v89_v26 }
 0x16d   :  { %v818_v42 = vmax.f32 %v675_v38, 0.0 }
 0x16e   :  { %v321_v43 = vpop.f32.mrf.mxu0 }
 0x16f   :  { %v322_v46 = vadd.f32 %v1557_v34, %v321_v43  ;;  %v876_v47 = vpack.c.bf16 %v818_v42, %v817_v39  ;;  %v1816_v43 = vld [vmem:[%s2287_s6] ss:$0 sm:$0xff] }
 0x171   :  { %v438_v49 = vmax.f32 %v322_v46, 0.0  ;;  %1382 = vmatmul.msk.bf16.gmra.mxu2 %vm541_vm1, %v876_v47 }
 0x172   :  { %v677_v50 = vpop.f32.mrf.mxu1 }
 0x173   :  { %v487_v52 = vpack.c.bf16 %v438_v49, %v437_v48  ;;  %v678_v56 = vadd.f32 %v1675_v1, %v677_v50 }
 0x175   :  { %1343 = vmatmul.msk.bf16.gmra.mxu1 %vm541_vm1, %v487_v52  ;;  %v819_v59 = vmax.f32 %v678_v56, 0.0 }
 0x176   :  { %v324_v41 = vpop.f32.mrf.mxu0 }
 0x177   :  { %v325_v60 = vadd.f32 %v1557_v34, %v324_v41 }
 0x179   :  { %1304 = vmatmul.msk.bf16.gmra.mxu0 %vm143_vm0, %v114_v53  ;;  %v439_v2 = vmax.f32 %v325_v60, 0.0  ;;  %v120_v53 = vpack.c.bf16 %v86_v35, %v85_v51 }
 0x17a   :  { %v679_v44 = vpop.f32.mrf.mxu1 }
 0x17b   :  { %v680_v58 = vadd.f32 %v1675_v1, %v679_v44  ;;  %1310 = vmatmul.msk.bf16.gmra.mxu3 %vm143_vm0, %v120_v53 }
 0x17d   :  { %v820_v61 = vmax.f32 %v680_v58, 0.0 }
 0x17e   :  { %v326_v62 = vpop.f32.mrf.mxu0 }
 0x17f   :  { %v327_v63 = vadd.f32 %v1557_v34, %v326_v62  ;;  %v877_v0 = vpack.c.bf16 %v820_v61, %v819_v59 }
 0x181   :  { %v440_v45 = vmax.f32 %v327_v63, 0.0  ;;  %1383 = vmatmul.msk.bf16.gmra.mxu2 %vm541_vm1, %v877_v0 }
 0x182   :  { %v682_v3 = vpop.f32.mrf.mxu1 }
 0x183   :  { %v488_v6 = vpack.c.bf16 %v440_v45, %v439_v2  ;;  %v683_v11 = vadd.f32 %v1675_v1, %v682_v3 }
 0x185   :  { %1344 = vmatmul.msk.bf16.gmra.mxu1 %vm541_vm1, %v488_v6  ;;  %v821_v15 = vmax.f32 %v683_v11, 0.0  ;;  %v88_v6 = vld [vmem:[%s2282_s0 + $0x1e8] sm:$0xff] }
 0x186   :  { %v329_v8 = vpop.f32.mrf.mxu0 }
 0x187   :  { %v330_v16 = vadd.f32 %v1557_v34, %v329_v8  ;;  %v121_v8 = vpack.c.bf16 %v88_v6, %v87_v5 }
 0x189   :  { %1305 = vmatmul.msk.bf16.gmra.mxu0 %vm143_vm0, %v115_v7  ;;  %v441_v21 = vmax.f32 %v330_v16, 0.0 }
 0x18a   :  { %v684_v13 = vpop.f32.mrf.mxu1 }
 0x18b   :  { %v685_v14 = vadd.f32 %v1675_v1, %v684_v13  ;;  %1311 = vmatmul.msk.bf16.gmra.mxu3 %vm143_vm0, %v121_v8 }
 0x18d   :  { %v822_v17 = vmax.f32 %v685_v14, 0.0 }
 0x18e   :  { %v331_v18 = vpop.f32.mrf.mxu0 }
 0x18f   :  { %v332_v19 = vadd.f32 %v1557_v34, %v331_v18  ;;  %v878_v20 = vpack.c.bf16 %v822_v17, %v821_v15 }
 0x191   :  { %v442_v22 = vmax.f32 %v332_v19, 0.0  ;;  %1384 = vmatmul.msk.bf16.gmra.mxu2 %vm541_vm1, %v878_v20 }
 0x192   :  { %v687_v23 = vpop.f32.mrf.mxu1 }
 0x193   :  { %v489_v24 = vpack.c.bf16 %v442_v22, %v441_v21  ;;  %v688_v28 = vadd.f32 %v1675_v1, %v687_v23 }
 0x195   :  { %1345 = vmatmul.msk.bf16.gmra.mxu1 %vm541_vm1, %v489_v24  ;;  %v823_v32 = vmax.f32 %v688_v28, 0.0 }
 0x196   :  { %v334_v25 = vpop.f32.mrf.mxu0 }
 0x197   :  { %v335_v33 = vadd.f32 %v1557_v34, %v334_v25 }
 0x199   :  { %v443_v40 = vmax.f32 %v335_v33, 0.0 }
 0x19a   :  { %v689_v30 = vpop.f32.mrf.mxu1 }
 0x19b   :  { %v690_v31 = vadd.f32 %v1675_v1, %v689_v30  ;;  %1312 = vmatmul.msk.bf16.gmra.mxu3 %vm143_vm0, %v122_v29 }
 0x19d   :  { %v824_v36 = vmax.f32 %v690_v31, 0.0 }
 0x19e   :  { %v336_v37 = vpop.f32.mrf.mxu0 }
 0x19f   :  { %v337_v38 = vadd.f32 %v1557_v34, %v336_v37  ;;  %v879_v39 = vpack.c.bf16 %v824_v36, %v823_v32 }
 0x1a1   :  { %v444_v42 = vmax.f32 %v337_v38, 0.0  ;;  %1385 = vmatmul.msk.bf16.gmra.mxu2 %vm541_vm1, %v879_v39 }
 0x1a2   :  { %v692_v46 = vpop.f32.mrf.mxu1 }
 0x1a3   :  { %v490_v47 = vpack.c.bf16 %v444_v42, %v443_v40  ;;  %v693_v52 = vadd.f32 %v1675_v1, %v692_v46 }
 0x1a4   :  { %v1044_v48 = vpop.f32.mrf.mxu2 }
 0x1a5   :  { %v1045_v49 = vadd.f32 %v1816_v43, %v1044_v48  ;;  %1346 = vmatmul.msk.bf16.gmra.mxu1 %vm541_vm1, %v490_v47  ;;  %v825_v56 = vmax.f32 %v693_v52, 0.0 }
 0x1a6   :  { %v339_v50 = vpop.f32.mrf.mxu0 }
 0x1a7   :  { %1205 = vst.msk [vmem:[%s2288_s7] sm:$0xff] %vm1204_vm2, %v1045_v49  ;;  %v340_v57 = vadd.f32 %v1557_v34, %v339_v50 }
 0x1a9   :  { %v445_v62 = vmax.f32 %v340_v57, 0.0 }
 0x1aa   :  { %v694_v41 = vpop.f32.mrf.mxu1 }
 0x1ab   :  { %v695_v54 = vadd.f32 %v1675_v1, %v694_v41 }
 0x1ac   :  { %v1046_v55 = vpop.f32.mrf.mxu2 }
 0x1ad   :  { %v826_v44 = vmax.f32 %v695_v54, 0.0  ;;  %v1047_v58 = vadd.f32 %v1816_v43, %v1046_v55 }
 0x1ae   :  { %v341_v59 = vpop.f32.mrf.mxu0 }
 0x1af   :  { %1206 = vst.msk [vmem:[%s2288_s7 + $0x8] sm:$0xff] %vm1204_vm2, %v1047_v58  ;;  %v342_v60 = vadd.f32 %v1557_v34, %v341_v59  ;;  %v880_v61 = vpack.c.bf16 %v826_v44, %v825_v56 }
 0x1b1   :  { %v446_v63 = vmax.f32 %v342_v60, 0.0  ;;  %1386 = vmatmul.msk.bf16.gmra.mxu2 %vm541_vm1, %v880_v61 }
 0x1b2   :  { %v697_v0 = vpop.f32.mrf.mxu1 }
 0x1b3   :  { %v491_v2 = vpack.c.bf16 %v446_v63, %v445_v62  ;;  %v698_v7 = vadd.f32 %v1675_v1, %v697_v0 }
 0x1b4   :  { %v1049_v45 = vpop.f32.mrf.mxu2 }
 0x1b5   :  { %v1050_v3 = vadd.f32 %v1816_v43, %v1049_v45  ;;  %1347 = vmatmul.msk.bf16.gmra.mxu1 %vm541_vm1, %v491_v2  ;;  %v827_v12 = vmax.f32 %v698_v7, 0.0 }
 0x1b6   :  { %v344_v4 = vpop.f32.mrf.mxu0 }
 0x1b7   :  { %1207 = vst.msk [vmem:[%s2288_s7 + $0x10] sm:$0xff] %vm1204_vm2, %v1050_v3  ;;  %v345_v13 = vadd.f32 %v1557_v34, %v344_v4 }
 0x1b9   :  { %v447_v19 = vmax.f32 %v345_v13, 0.0 }
 0x1ba   :  { %v699_v9 = vpop.f32.mrf.mxu1 }
 0x1bb   :  { %v700_v10 = vadd.f32 %v1675_v1, %v699_v9 }
 0x1bc   :  { %v1051_v11 = vpop.f32.mrf.mxu2 }
 0x1bd   :  { %v828_v14 = vmax.f32 %v700_v10, 0.0  ;;  %v1052_v15 = vadd.f32 %v1816_v43, %v1051_v11 }
 0x1be   :  { %v346_v16 = vpop.f32.mrf.mxu0 }
 0x1bf   :  { %1208 = vst.msk [vmem:[%s2288_s7 + $0x18] sm:$0xff] %vm1204_vm2, %v1052_v15  ;;  %v347_v17 = vadd.f32 %v1557_v34, %v346_v16  ;;  %v881_v18 = vpack.c.bf16 %v828_v14, %v827_v12 }
 0x1c1   :  { %v448_v20 = vmax.f32 %v347_v17, 0.0  ;;  %1387 = vmatmul.msk.bf16.gmra.mxu2 %vm541_vm1, %v881_v18 }
 0x1c2   :  { %v702_v21 = vpop.f32.mrf.mxu1 }
 0x1c3   :  { %v492_v22 = vpack.c.bf16 %v448_v20, %v447_v19  ;;  %v703_v28 = vadd.f32 %v1675_v1, %v702_v21 }
 0x1c4   :  { %v1054_v23 = vpop.f32.mrf.mxu2 }
 0x1c5   :  { %v1055_v24 = vadd.f32 %v1816_v43, %v1054_v23  ;;  %1348 = vmatmul.msk.bf16.gmra.mxu1 %vm541_vm1, %v492_v22  ;;  %v829_v33 = vmax.f32 %v703_v28, 0.0  ;;  %v374_v22 = vpop.f32.mrf.mxu3 }
 0x1c6   :  { %v349_v25 = vpop.f32.mrf.mxu0 }
 0x1c7   :  { %1209 = vst.msk [vmem:[%s2288_s7 + $0x20] sm:$0xff] %vm1204_vm2, %v1055_v24  ;;  %v350_v36 = vadd.f32 %v1557_v34, %v349_v25 }
 0x1c9   :  { %v449_v46 = vmax.f32 %v350_v36, 0.0 }
 0x1ca   :  { %v704_v30 = vpop.f32.mrf.mxu1 }
 0x1cb   :  { %v705_v31 = vadd.f32 %v1675_v1, %v704_v30 }
 0x1cc   :  { %v1056_v32 = vpop.f32.mrf.mxu2 }
 0x1cd   :  { %v830_v37 = vmax.f32 %v705_v31, 0.0  ;;  %v1057_v38 = vadd.f32 %v1816_v43, %v1056_v32  ;;  %v376_v36 = vpop.f32.mrf.mxu3 }
 0x1ce   :  { %v351_v39 = vpop.f32.mrf.mxu0 }
 0x1cf   :  { %1210 = vst.msk [vmem:[%s2288_s7 + $0x28] sm:$0xff] %vm1204_vm2, %v1057_v38  ;;  %v352_v40 = vadd.f32 %v1557_v34, %v351_v39  ;;  %v882_v42 = vpack.c.bf16 %v830_v37, %v829_v33 }
 0x1d1   :  { %v450_v47 = vmax.f32 %v352_v40, 0.0  ;;  %1388 = vmatmul.msk.bf16.gmra.mxu2 %vm541_vm1, %v882_v42 }
 0x1d2   :  { %v707_v48 = vpop.f32.mrf.mxu1 }
 0x1d3   :  { %v493_v49 = vpack.c.bf16 %v450_v47, %v449_v46  ;;  %v708_v52 = vadd.f32 %v1675_v1, %v707_v48 }
 0x1d4   :  { %v1059_v50 = vpop.f32.mrf.mxu2 }
 0x1d5   :  { %v1060_v51 = vadd.f32 %v1816_v43, %v1059_v50  ;;  %1349 = vmatmul.msk.bf16.gmra.mxu1 %vm541_vm1, %v493_v49  ;;  %v831_v55 = vmax.f32 %v708_v52, 0.0  ;;  %v379_v50 = vpop.f32.mrf.mxu3 }
 0x1d6   :  { %v354_v35 = vpop.f32.mrf.mxu0 }
 0x1d7   :  { %1211 = vst.msk [vmem:[%s2288_s7 + $0x30] sm:$0xff] %vm1204_vm2, %v1060_v51  ;;  %v355_v56 = vadd.f32 %v1557_v34, %v354_v35 }
 0x1d9   :  { %v451_v61 = vmax.f32 %v355_v56, 0.0 }
 0x1da   :  { %v709_v53 = vpop.f32.mrf.mxu1 }
 0x1db   :  { %v710_v41 = vadd.f32 %v1675_v1, %v709_v53 }
 0x1dc   :  { %v1061_v54 = vpop.f32.mrf.mxu2 }
 0x1dd   :  { %v832_v57 = vmax.f32 %v710_v41, 0.0  ;;  %v1062_v44 = vadd.f32 %v1816_v43, %v1061_v54 }
 0x1de   :  { %v356_v58 = vpop.f32.mrf.mxu0 }
 0x1df   :  { %v883_v59 = vpack.c.bf16 %v832_v57, %v831_v55  ;;  %1212 = vst.msk [vmem:[%s2288_s7 + $0x38] sm:$0xff] %vm1204_vm2, %v1062_v44  ;;  %v357_v60 = vadd.f32 %v1557_v34, %v356_v58 }
 0x1e1   :  { %v452_v62 = vmax.f32 %v357_v60, 0.0  ;;  %1389 = vmatmul.msk.bf16.gmra.mxu2 %vm541_vm1, %v883_v59 }
 0x1e2   :  { %v712_v63 = vpop.f32.mrf.mxu1 }
 0x1e3   :  { %v494_v0 = vpack.c.bf16 %v452_v62, %v451_v61  ;;  %v713_v4 = vadd.f32 %v1675_v1, %v712_v63  ;;  %v381_v62 = vpop.f32.mrf.mxu3 }
 0x1e4   :  { %v1064_v2 = vpop.f32.mrf.mxu2 }
 0x1e5   :  { %v1065_v45 = vadd.f32 %v1816_v43, %v1064_v2  ;;  %1350 = vmatmul.msk.bf16.gmra.mxu1 %vm541_vm1, %v494_v0  ;;  %v833_v8 = vmax.f32 %v713_v4, 0.0 }
 0x1e6   :  { %v359_v3 = vpop.f32.mrf.mxu0 }
 0x1e7   :  { %1213 = vst.msk [vmem:[%s2288_s7 + $0x40] sm:$0xff] %vm1204_vm2, %v1065_v45  ;;  %v360_v9 = vadd.f32 %v1557_v34, %v359_v3  ;;  %v375_v45 = vadd.f32 %v1557_v34, %v374_v22  ;;  %v377_v3 = vadd.f32 %v1557_v34, %v376_v36 }
 0x1e9   :  { %v453_v15 = vmax.f32 %v360_v9, 0.0 }
 0x1ea   :  { %v714_v5 = vpop.f32.mrf.mxu1 }
 0x1eb   :  { %v715_v6 = vadd.f32 %v1675_v1, %v714_v5  ;;  %v384_v9 = vpop.f32.mrf.mxu3 }
 0x1ec   :  { %v1066_v7 = vpop.f32.mrf.mxu2 }
 0x1ed   :  { %v834_v10 = vmax.f32 %v715_v6, 0.0  ;;  %v1067_v11 = vadd.f32 %v1816_v43, %v1066_v7 }
 0x1ee   :  { %v361_v12 = vpop.f32.mrf.mxu0 }
 0x1ef   :  { %v884_v13 = vpack.c.bf16 %v834_v10, %v833_v8  ;;  %1214 = vst.msk [vmem:[%s2288_s7 + $0x48] sm:$0xff] %vm1204_vm2, %v1067_v11  ;;  %v362_v14 = vadd.f32 %v1557_v34, %v361_v12  ;;  %v459_v10 = vmax.f32 %v375_v45, 0.0  ;;  %v460_v11 = vmax.f32 %v377_v3, 0.0 }
 0x1f1   :  { %v454_v16 = vmax.f32 %v362_v14, 0.0  ;;  %1390 = vmatmul.msk.bf16.gmra.mxu2 %vm541_vm1, %v884_v13 }
 0x1f2   :  { %v717_v17 = vpop.f32.mrf.mxu1 }
 0x1f3   :  { %v495_v18 = vpack.c.bf16 %v454_v16, %v453_v15  ;;  %v718_v23 = vadd.f32 %v1675_v1, %v717_v17  ;;  %v386_v16 = vpop.f32.mrf.mxu3 }
 0x1f4   :  { %v1069_v19 = vpop.f32.mrf.mxu2 }
 0x1f5   :  { %v1070_v20 = vadd.f32 %v1816_v43, %v1069_v19  ;;  %1351 = vmatmul.msk.bf16.gmra.mxu1 %vm541_vm1, %v495_v18  ;;  %v835_v27 = vmax.f32 %v718_v23, 0.0  ;;  %v1977_v19 = vld [vmem:[%s2283_s2] ss:$0 sm:$0xff] }
 0x1f6   :  { %v364_v21 = vpop.f32.mrf.mxu0 }
 0x1f7   :  { %1215 = vst.msk [vmem:[%s2288_s7 + $0x50] sm:$0xff] %vm1204_vm2, %v1070_v20  ;;  %v365_v28 = vadd.f32 %v1557_v34, %v364_v21  ;;  %v380_v20 = vadd.f32 %v1977_v19, %v379_v50  ;;  %v382_v21 = vadd.f32 %v1977_v19, %v381_v62 }
 0x1f9   :  { %v455_v37 = vmax.f32 %v365_v28, 0.0  ;;  %v462_v28 = vmax.f32 %v382_v21, 0.0 }
 0x1fa   :  { %v719_v24 = vpop.f32.mrf.mxu1 }
 0x1fb   :  { %v720_v25 = vadd.f32 %v1675_v1, %v719_v24 }
 0x1fc   :  { %v1071_v26 = vpop.f32.mrf.mxu2 }
 0x1fd   :  { %v836_v29 = vmax.f32 %v720_v25, 0.0  ;;  %v1072_v30 = vadd.f32 %v1816_v43, %v1071_v26 }
 0x1fe   :  { %v366_v31 = vpop.f32.mrf.mxu0 }
 0x1ff   :  { %v885_v32 = vpack.c.bf16 %v836_v29, %v835_v27  ;;  %1216 = vst.msk [vmem:[%s2288_s7 + $0x58] sm:$0xff] %vm1204_vm2, %v1072_v30  ;;  %v367_v33 = vadd.f32 %v1557_v34, %v366_v31  ;;  %v461_v27 = vmax.f32 %v380_v20, 0.0  ;;  %v389_v31 = vpop.f32.mrf.mxu3 }
 0x201   :  { %v456_v38 = vmax.f32 %v367_v33, 0.0  ;;  %1391 = vmatmul.msk.bf16.gmra.mxu2 %vm541_vm1, %v885_v32  ;;  %v499_v32 = vpack.c.bf16 %v462_v28, %v461_v27 }
 0x202   :  { %v722_v39 = vpop.f32.mrf.mxu1 }
 0x203   :  { %v496_v40 = vpack.c.bf16 %v456_v38, %v455_v37  ;;  %v723_v48 = vadd.f32 %v1675_v1, %v722_v39  ;;  %v385_v39 = vadd.f32 %v1977_v19, %v384_v9 }
 0x204   :  { %v1074_v42 = vpop.f32.mrf.mxu2 }
 0x205   :  { %v1075_v46 = vadd.f32 %v1816_v43, %v1074_v42  ;;  %1352 = vmatmul.msk.bf16.gmra.mxu1 %vm541_vm1, %v496_v40  ;;  %v837_v52 = vmax.f32 %v723_v48, 0.0  ;;  %v387_v40 = vadd.f32 %v1977_v19, %v386_v16 }
 0x206   :  { %v369_v47 = vpop.f32.mrf.mxu0 }
 0x207   :  { %1217 = vst.msk [vmem:[%s2288_s7 + $0x60] sm:$0xff] %vm1204_vm2, %v1075_v46  ;;  %v370_v53 = vadd.f32 %v1557_v34, %v369_v47  ;;  %v391_v47 = vpop.f32.mrf.mxu3 }
 0x209   :  { %v457_v44 = vmax.f32 %v370_v53, 0.0 }
 0x20a   :  { %v724_v49 = vpop.f32.mrf.mxu1 }
 0x20b   :  { %v725_v51 = vadd.f32 %v1675_v1, %v724_v49 }
 0x20c   :  { %v1076_v35 = vpop.f32.mrf.mxu2 }
 0x20d   :  { %v838_v41 = vmax.f32 %v725_v51, 0.0  ;;  %v1077_v54 = vadd.f32 %v1816_v43, %v1076_v35  ;;  %v463_v51 = vmax.f32 %v385_v39, 0.0  ;;  %v464_v35 = vmax.f32 %v387_v40, 0.0 }
 0x20e   :  { %v371_v55 = vpop.f32.mrf.mxu0 }
 0x20f   :  { %v886_v56 = vpack.c.bf16 %v838_v41, %v837_v52  ;;  %1218 = vst.msk [vmem:[%s2288_s7 + $0x68] sm:$0xff] %vm1204_vm2, %v1077_v54  ;;  %v372_v57 = vadd.f32 %v1557_v34, %v371_v55  ;;  %v498_v34 = vpack.c.bf16 %v460_v11, %v459_v10  ;;  %v500_v41 = vpack.c.bf16 %v464_v35, %v463_v51 }
 0x211   :  { %v458_v58 = vmax.f32 %v372_v57, 0.0  ;;  %1392 = vmatmul.msk.bf16.gmra.mxu2 %vm541_vm1, %v886_v56  ;;  %v394_v56 = vpop.f32.mrf.mxu3 }
 0x212   :  { %v727_v59 = vpop.f32.mrf.mxu1 }
 0x213   :  { %v497_v60 = vpack.c.bf16 %v458_v58, %v457_v44  ;;  %v728_v0 = vadd.f32 %v1675_v1, %v727_v59  ;;  %v390_v58 = vadd.f32 %v1977_v19, %v389_v31  ;;  %v392_v59 = vadd.f32 %v1977_v19, %v391_v47 }
 0x214   :  { %v1079_v61 = vpop.f32.mrf.mxu2 }
 0x215   :  { %v1080_v63 = vadd.f32 %v1816_v43, %v1079_v61  ;;  %1353 = vmatmul.msk.bf16.vlgmr.msrb.gmra.mxu3 %vm541_vm1, %v497_v60  ;;  %v839_v6 = vmax.f32 %v728_v0, 0.0  ;;  %v466_v45 = vmax.f32 %v392_v59, 0.0 }
 0x217   :  { %1219 = vst.msk [vmem:[%s2288_s7 + $0x70] sm:$0xff] %vm1204_vm2, %v1080_v63 }
 0x21a   :  { %v729_v2 = vpop.f32.mrf.mxu1 }
 0x21b   :  { %v730_v4 = vadd.f32 %v1675_v1, %v729_v2  ;;  %v465_v2 = vmax.f32 %v390_v58, 0.0 }
 0x21c   :  { %v1081_v5 = vpop.f32.mrf.mxu2 }
 0x21d   :  { %v840_v7 = vmax.f32 %v730_v4, 0.0  ;;  %v1082_v8 = vadd.f32 %v1816_v43, %v1081_v5  ;;  %v396_v4 = vpop.f32.mrf.mxu3 }
 0x21f   :  { %v887_v12 = vpack.c.bf16 %v840_v7, %v839_v6  ;;  %1220 = vst.msk [vmem:[%s2288_s7 + $0x78] sm:$0xff] %vm1204_vm2, %v1082_v8  ;;  %v501_v6 = vpack.c.bf16 %v466_v45, %v465_v2 }
 0x221   :  { %1393 = vmatmul.msk.bf16.gmra.mxu2 %vm541_vm1, %v887_v12  ;;  %v395_v12 = vadd.f32 %v1977_v19, %v394_v56 }
 0x222   :  { %v732_v13 = vpop.f32.mrf.mxu1 }
 0x223   :  { %v733_v17 = vadd.f32 %v1675_v1, %v732_v13  ;;  %v397_v13 = vadd.f32 %v1977_v19, %v396_v4 }
 0x224   :  { %v1084_v14 = vpop.f32.mrf.mxu2 }
 0x225   :  { %v1085_v15 = vadd.f32 %v1816_v43, %v1084_v14  ;;  %1354 = vmatmul.msk.bf16.gmra.mxu3 %vm541_vm1, %v498_v34  ;;  %v841_v24 = vmax.f32 %v733_v17, 0.0  ;;  %v399_v11 = vpop.f32.mrf.mxu3  ;;  %v468_v20 = vmax.f32 %v397_v13, 0.0 }
 0x227   :  { %1221 = vst.msk [vmem:[%s2288_s7 + $0x80] sm:$0xff] %vm1204_vm2, %v1085_v15 }
 0x22a   :  { %v734_v18 = vpop.f32.mrf.mxu1 }
 0x22b   :  { %v735_v22 = vadd.f32 %v1675_v1, %v734_v18  ;;  %v467_v18 = vmax.f32 %v395_v12, 0.0 }
 0x22c   :  { %v1086_v23 = vpop.f32.mrf.mxu2 }
 0x22d   :  { %v842_v25 = vmax.f32 %v735_v22, 0.0  ;;  %v1087_v26 = vadd.f32 %v1816_v43, %v1086_v23  ;;  %v502_v23 = vpack.c.bf16 %v468_v20, %v467_v18 }
 0x22f   :  { %v888_v29 = vpack.c.bf16 %v842_v25, %v841_v24  ;;  %1222 = vst.msk [vmem:[%s2288_s7 + $0x88] sm:$0xff] %vm1204_vm2, %v1087_v26  ;;  %v401_v25 = vpop.f32.mrf.mxu3 }
 0x231   :  { %1394 = vmatmul.msk.bf16.gmra.mxu2 %vm541_vm1, %v888_v29  ;;  %v400_v29 = vadd.f32 %v1977_v19, %v399_v11 }
 0x232   :  { %v737_v30 = vpop.f32.mrf.mxu1 }
 0x233   :  { %v738_v37 = vadd.f32 %v1675_v1, %v737_v30  ;;  %v402_v30 = vadd.f32 %v1977_v19, %v401_v25  ;;  %v469_v39 = vmax.f32 %v400_v29, 0.0 }
 0x234   :  { %v1089_v33 = vpop.f32.mrf.mxu2 }
 0x235   :  { %v1090_v36 = vadd.f32 %v1816_v43, %v1089_v33  ;;  %1355 = vmatmul.msk.bf16.gmra.mxu3 %vm541_vm1, %v499_v32  ;;  %v843_v48 = vmax.f32 %v738_v37, 0.0  ;;  %v470_v40 = vmax.f32 %v402_v30, 0.0 }
 0x237   :  { %1223 = vst.msk [vmem:[%s2288_s7 + $0x90] sm:$0xff] %vm1204_vm2, %v1090_v36  ;;  %v503_v47 = vpack.c.bf16 %v470_v40, %v469_v39 }
 0x23a   :  { %v739_v38 = vpop.f32.mrf.mxu1 }
 0x23b   :  { %v740_v42 = vadd.f32 %v1675_v1, %v739_v38  ;;  %v404_v38 = vpop.f32.mrf.mxu3 }
 0x23c   :  { %v1091_v46 = vpop.f32.mrf.mxu2 }
 0x23d   :  { %v844_v49 = vmax.f32 %v740_v42, 0.0  ;;  %v1092_v50 = vadd.f32 %v1816_v43, %v1091_v46 }
 0x23f   :  { %v889_v52 = vpack.c.bf16 %v844_v49, %v843_v48  ;;  %1224 = vst.msk [vmem:[%s2288_s7 + $0x98] sm:$0xff] %vm1204_vm2, %v1092_v50 }
 0x241   :  { %1395 = vmatmul.msk.bf16.gmra.mxu2 %vm541_vm1, %v889_v52  ;;  %v405_v52 = vadd.f32 %v1977_v19, %v404_v38 }
 0x242   :  { %v742_v53 = vpop.f32.mrf.mxu1 }
 0x243   :  { %v743_v57 = vadd.f32 %v1675_v1, %v742_v53  ;;  %v406_v50 = vpop.f32.mrf.mxu3 }
 0x244   :  { %v1094_v54 = vpop.f32.mrf.mxu2  ;;  %v407_v53 = vadd.f32 %v1977_v19, %v406_v50 }
 0x245   :  { %v1095_v55 = vadd.f32 %v1816_v43, %v1094_v54  ;;  %1356 = vmatmul.msk.bf16.gmra.mxu3 %vm541_vm1, %v500_v41  ;;  %v845_v62 = vmax.f32 %v743_v57, 0.0 }
 0x246   :  { %v472_v58 = vmax.f32 %v407_v53, 0.0 }
 0x247   :  { %1225 = vst.msk [vmem:[%s2288_s7 + $0xa0] sm:$0xff] %vm1204_vm2, %v1095_v55 }
 0x24a   :  { %v744_v44 = vpop.f32.mrf.mxu1 }
 0x24b   :  { %v745_v60 = vadd.f32 %v1675_v1, %v744_v44  ;;  %v471_v44 = vmax.f32 %v405_v52, 0.0 }
 0x24c   :  { %v1096_v61 = vpop.f32.mrf.mxu2 }
 0x24d   :  { %v846_v63 = vmax.f32 %v745_v60, 0.0  ;;  %v1097_v0 = vadd.f32 %v1816_v43, %v1096_v61  ;;  %v504_v61 = vpack.c.bf16 %v472_v58, %v471_v44 }
 0x24f   :  { %v890_v3 = vpack.c.bf16 %v846_v63, %v845_v62  ;;  %1226 = vst.msk [vmem:[%s2288_s7 + $0xa8] sm:$0xff] %vm1204_vm2, %v1097_v0  ;;  %v2077_v62 = vld [vmem:[%s2285_s4] ss:$0 sm:$0xff] }
 0x251   :  { %1396 = vmatmul.msk.bf16.gmra.mxu2 %vm541_vm1, %v890_v3 }
 0x252   :  { %v747_v5 = vpop.f32.mrf.mxu1 }
 0x253   :  { %v748_v9 = vadd.f32 %v1675_v1, %v747_v5 }
 0x254   :  { %v1099_v7 = vpop.f32.mrf.mxu2 }
 0x255   :  { %v1100_v8 = vadd.f32 %v1816_v43, %v1099_v7  ;;  %1357 = vmatmul.msk.bf16.gmra.mxu3 %vm541_vm1, %v501_v6  ;;  %v847_v15 = vmax.f32 %v748_v9, 0.0 }
 0x257   :  { %1227 = vst.msk [vmem:[%s2288_s7 + $0xb0] sm:$0xff] %vm1204_vm2, %v1100_v8 }
 0x25a   :  { %v749_v10 = vpop.f32.mrf.mxu1 }
 0x25b   :  { %v750_v34 = vadd.f32 %v1675_v1, %v749_v10 }
 0x25c   :  { %v1101_v14 = vpop.f32.mrf.mxu2 }
 0x25d   :  { %v848_v16 = vmax.f32 %v750_v34, 0.0  ;;  %v1102_v17 = vadd.f32 %v1816_v43, %v1101_v14 }
 0x25f   :  { %v891_v21 = vpack.c.bf16 %v848_v16, %v847_v15  ;;  %1228 = vst.msk [vmem:[%s2288_s7 + $0xb8] sm:$0xff] %vm1204_vm2, %v1102_v17 }
 0x261   :  { %1397 = vmatmul.msk.bf16.gmra.mxu2 %vm541_vm1, %v891_v21 }
 0x262   :  { %v752_v22 = vpop.f32.mrf.mxu1 }
 0x263   :  { %v753_v27 = vadd.f32 %v1675_v1, %v752_v22 }
 0x264   :  { %v1104_v24 = vpop.f32.mrf.mxu2 }
 0x265   :  { %v1105_v26 = vadd.f32 %v1816_v43, %v1104_v24  ;;  %1358 = vmatmul.msk.bf16.gmra.mxu3 %vm541_vm1, %v502_v23  ;;  %v849_v33 = vmax.f32 %v753_v27, 0.0 }
 0x267   :  { %1229 = vst.msk [vmem:[%s2288_s7 + $0xc0] sm:$0xff] %vm1204_vm2, %v1105_v26 }
 0x26a   :  { %v754_v28 = vpop.f32.mrf.mxu1 }
 0x26b   :  { %v755_v31 = vadd.f32 %v1675_v1, %v754_v28 }
 0x26c   :  { %v1106_v32 = vpop.f32.mrf.mxu2 }
 0x26d   :  { %v850_v36 = vmax.f32 %v755_v31, 0.0  ;;  %v1107_v37 = vadd.f32 %v1816_v43, %v1106_v32 }
 0x26f   :  { %v892_v42 = vpack.c.bf16 %v850_v36, %v849_v33  ;;  %1230 = vst.msk [vmem:[%s2288_s7 + $0xc8] sm:$0xff] %vm1204_vm2, %v1107_v37 }
 0x271   :  { %1398 = vmatmul.msk.bf16.gmra.mxu2 %vm541_vm1, %v892_v42 }
 0x272   :  { %v757_v46 = vpop.f32.mrf.mxu1 }
 0x273   :  { %v758_v51 = vadd.f32 %v1675_v1, %v757_v46 }
 0x274   :  { %v1109_v48 = vpop.f32.mrf.mxu2 }
 0x275   :  { %v1110_v49 = vadd.f32 %v1816_v43, %v1109_v48  ;;  %1359 = vmatmul.msk.bf16.gmra.mxu3 %vm541_vm1, %v503_v47  ;;  %v851_v55 = vmax.f32 %v758_v51, 0.0 }
 0x277   :  { %1231 = vst.msk [vmem:[%s2288_s7 + $0xd0] sm:$0xff] %vm1204_vm2, %v1110_v49 }
 0x27a   :  { %v759_v35 = vpop.f32.mrf.mxu1 }
 0x27b   :  { %v760_v41 = vadd.f32 %v1675_v1, %v759_v35 }
 0x27c   :  { %v1111_v54 = vpop.f32.mrf.mxu2 }
 0x27d   :  { %v852_v56 = vmax.f32 %v760_v41, 0.0  ;;  %v1112_v57 = vadd.f32 %v1816_v43, %v1111_v54 }
 0x27f   :  { %v893_v59 = vpack.c.bf16 %v852_v56, %v851_v55  ;;  %1232 = vst.msk [vmem:[%s2288_s7 + $0xd8] sm:$0xff] %vm1204_vm2, %v1112_v57 }
 0x281   :  { %1399 = vmatmul.msk.bf16.gmra.mxu2 %vm541_vm1, %v893_v59 }
 0x282   :  { %v762_v60 = vpop.f32.mrf.mxu1 }
 0x283   :  { %v763_v63 = vadd.f32 %v2077_v62, %v762_v60 }
 0x284   :  { %v1114_v19 = vpop.f32.mrf.mxu2 }
 0x285   :  { %v1115_v1 = vadd.f32 %v1816_v43, %v1114_v19  ;;  %1360 = vmatmul.msk.bf16.gmra.mxu3 %vm541_vm1, %v504_v61  ;;  %v853_v3 = vmax.f32 %v763_v63, 0.0 }
 0x287   :  { %1233 = vst.msk [vmem:[%s2288_s7 + $0xe0] sm:$0xff] %vm1204_vm2, %v1115_v1 }
 0x28a   :  { %v764_v0 = vpop.f32.mrf.mxu1 }
 0x28b   :  { %v765_v2 = vadd.f32 %v2077_v62, %v764_v0 }
 0x28c   :  { %v1116_v45 = vpop.f32.mrf.mxu2 }
 0x28d   :  { %v854_v4 = vmax.f32 %v765_v2, 0.0  ;;  %v1117_v5 = vadd.f32 %v1816_v43, %v1116_v45 }
 0x28f   :  { %v894_v6 = vpack.c.bf16 %v854_v4, %v853_v3  ;;  %1234 = vst.msk [vmem:[%s2288_s7 + $0xe8] sm:$0xff] %vm1204_vm2, %v1117_v5 }
 0x291   :  { %1400 = vmatmul.msk.bf16.gmra.mxu2 %vm541_vm1, %v894_v6 }
 0x294   :  { %v1119_v7 = vpop.f32.mrf.mxu2 }
 0x295   :  { %v1120_v8 = vadd.f32 %v1816_v43, %v1119_v7 }
 0x297   :  { %1235 = vst.msk [vmem:[%s2288_s7 + $0xf0] sm:$0xff] %vm1204_vm2, %v1120_v8 }
 0x298   :  { %v767_v9 = vpop.f32.mrf.mxu3 }
 0x299   :  { %v768_v12 = vadd.f32 %v2077_v62, %v767_v9 }
 0x29b   :  { %v855_v14 = vmax.f32 %v768_v12, 0.0 }
 0x29c   :  { %v1121_v10 = vpop.f32.mrf.mxu2 }
 0x29d   :  { %v1122_v11 = vadd.f32 %v1816_v43, %v1121_v10 }
 0x29f   :  { %1236 = vst.msk [vmem:[%s2288_s7 + $0xf8] sm:$0xff] %vm1204_vm2, %v1122_v11 }
 0x2a0   :  { %v769_v13 = vpop.f32.mrf.mxu3 }
 0x2a1   :  { %v770_v34 = vadd.f32 %v2077_v62, %v769_v13 }
 0x2a3   :  { %v856_v15 = vmax.f32 %v770_v34, 0.0 }
 0x2a4   :  { %v1124_v16 = vpop.f32.mrf.mxu2 }
 0x2a5   :  { %v895_v17 = vpack.c.bf16 %v856_v15, %v855_v14  ;;  %v1125_v18 = vadd.f32 %v1816_v43, %v1124_v16 }
 0x2a7   :  { %1237 = vst.msk [vmem:[%s2288_s7 + $0x100] sm:$0xff] %vm1204_vm2, %v1125_v18  ;;  %1401 = vmatmul.msk.bf16.vlgmr.msra.gmra.mxu3 %vm541_vm1, %v895_v17 }
 0x2a8   :  { %v772_v20 = vpop.f32.mrf.mxu3 }
 0x2a9   :  { %v773_v23 = vadd.f32 %v2077_v62, %v772_v20 }
 0x2ab   :  { %v857_v26 = vmax.f32 %v773_v23, 0.0 }
 0x2ac   :  { %v1126_v21 = vpop.f32.mrf.mxu2 }
 0x2ad   :  { %v1127_v22 = vadd.f32 %v1816_v43, %v1126_v21 }
 0x2af   :  { %1238 = vst.msk [vmem:[%s2288_s7 + $0x108] sm:$0xff] %vm1204_vm2, %v1127_v22 }
 0x2b0   :  { %v774_v24 = vpop.f32.mrf.mxu3 }
 0x2b1   :  { %v775_v25 = vadd.f32 %v2077_v62, %v774_v24 }
 0x2b3   :  { %v858_v27 = vmax.f32 %v775_v25, 0.0 }
 0x2b4   :  { %v1129_v28 = vpop.f32.mrf.mxu2 }
 0x2b5   :  { %v896_v29 = vpack.c.bf16 %v858_v27, %v857_v26  ;;  %v1130_v30 = vadd.f32 %v1816_v43, %v1129_v28 }
 0x2b7   :  { %1239 = vst.msk [vmem:[%s2288_s7 + $0x110] sm:$0xff] %vm1204_vm2, %v1130_v30  ;;  %1402 = vmatmul.msk.bf16.gmra.mxu3 %vm541_vm1, %v896_v29 }
 0x2b8   :  { %v777_v31 = vpop.f32.mrf.mxu3 }
 0x2b9   :  { %v778_v36 = vadd.f32 %v2077_v62, %v777_v31 }
 0x2bb   :  { %v859_v39 = vmax.f32 %v778_v36, 0.0 }
 0x2bc   :  { %v1131_v32 = vpop.f32.mrf.mxu2 }
 0x2bd   :  { %v1132_v33 = vadd.f32 %v1816_v43, %v1131_v32 }
 0x2bf   :  { %1240 = vst.msk [vmem:[%s2288_s7 + $0x118] sm:$0xff] %vm1204_vm2, %v1132_v33 }
 0x2c0   :  { %v779_v37 = vpop.f32.mrf.mxu3 }
 0x2c1   :  { %v780_v38 = vadd.f32 %v2077_v62, %v779_v37 }
 0x2c3   :  { %v860_v40 = vmax.f32 %v780_v38, 0.0 }
 0x2c4   :  { %v1134_v42 = vpop.f32.mrf.mxu2 }
 0x2c5   :  { %v897_v46 = vpack.c.bf16 %v860_v40, %v859_v39  ;;  %v1135_v47 = vadd.f32 %v1816_v43, %v1134_v42 }
 0x2c7   :  { %1241 = vst.msk [vmem:[%s2288_s7 + $0x120] sm:$0xff] %vm1204_vm2, %v1135_v47  ;;  %1403 = vmatmul.msk.bf16.gmra.mxu3 %vm541_vm1, %v897_v46 }
 0x2c8   :  { %v782_v48 = vpop.f32.mrf.mxu3 }
 0x2c9   :  { %v783_v51 = vadd.f32 %v2077_v62, %v782_v48 }
 0x2cb   :  { %v861_v53 = vmax.f32 %v783_v51, 0.0 }
 0x2cc   :  { %v1136_v49 = vpop.f32.mrf.mxu2 }
 0x2cd   :  { %v1137_v50 = vadd.f32 %v1816_v43, %v1136_v49 }
 0x2cf   :  { %1242 = vst.msk [vmem:[%s2288_s7 + $0x128] sm:$0xff] %vm1204_vm2, %v1137_v50 }
 0x2d0   :  { %v784_v35 = vpop.f32.mrf.mxu3 }
 0x2d1   :  { %v785_v52 = vadd.f32 %v2077_v62, %v784_v35 }
 0x2d3   :  { %v862_v41 = vmax.f32 %v785_v52, 0.0 }
 0x2d4   :  { %v1139_v54 = vpop.f32.mrf.mxu2 }
 0x2d5   :  { %v898_v55 = vpack.c.bf16 %v862_v41, %v861_v53  ;;  %v1140_v56 = vadd.f32 %v1816_v43, %v1139_v54 }
 0x2d7   :  { %1243 = vst.msk [vmem:[%s2288_s7 + $0x130] sm:$0xff] %vm1204_vm2, %v1140_v56  ;;  %1404 = vmatmul.msk.bf16.gmra.mxu3 %vm541_vm1, %v898_v55 }
 0x2d8   :  { %v787_v57 = vpop.f32.mrf.mxu3 }
 0x2d9   :  { %v788_v59 = vadd.f32 %v2077_v62, %v787_v57 }
 0x2db   :  { %v863_v19 = vmax.f32 %v788_v59, 0.0 }
 0x2dc   :  { %v1141_v44 = vpop.f32.mrf.mxu2 }
 0x2dd   :  { %v1142_v58 = vadd.f32 %v1816_v43, %v1141_v44 }
 0x2df   :  { %1244 = vst.msk [vmem:[%s2288_s7 + $0x138] sm:$0xff] %vm1204_vm2, %v1142_v58 }
 0x2e0   :  { %v789_v60 = vpop.f32.mrf.mxu3 }
 0x2e1   :  { %v790_v61 = vadd.f32 %v2077_v62, %v789_v60 }
 0x2e3   :  { %v864_v1 = vmax.f32 %v790_v61, 0.0 }
 0x2e4   :  { %v1144_v63 = vpop.f32.mrf.mxu2 }
 0x2e5   :  { %v899_v0 = vpack.c.bf16 %v864_v1, %v863_v19  ;;  %v1145_v2 = vadd.f32 %v1816_v43, %v1144_v63 }
 0x2e7   :  { %1245 = vst.msk [vmem:[%s2288_s7 + $0x140] sm:$0xff] %vm1204_vm2, %v1145_v2  ;;  %1405 = vmatmul.msk.bf16.gmra.mxu3 %vm541_vm1, %v899_v0 }
 0x2e8   :  { %v792_v45 = vpop.f32.mrf.mxu3 }
 0x2e9   :  { %v793_v5 = vadd.f32 %v2077_v62, %v792_v45 }
 0x2eb   :  { %v865_v8 = vmax.f32 %v793_v5, 0.0 }
 0x2ec   :  { %v1146_v3 = vpop.f32.mrf.mxu2 }
 0x2ed   :  { %v1147_v4 = vadd.f32 %v1816_v43, %v1146_v3 }
 0x2ef   :  { %1246 = vst.msk [vmem:[%s2288_s7 + $0x148] sm:$0xff] %vm1204_vm2, %v1147_v4 }
 0x2f0   :  { %v794_v6 = vpop.f32.mrf.mxu3 }
 0x2f1   :  { %v795_v7 = vadd.f32 %v2077_v62, %v794_v6 }
 0x2f3   :  { %v866_v9 = vmax.f32 %v795_v7, 0.0 }
 0x2f4   :  { %v1149_v10 = vpop.f32.mrf.mxu2 }
 0x2f5   :  { %v900_v11 = vpack.c.bf16 %v866_v9, %v865_v8  ;;  %v1150_v12 = vadd.f32 %v1816_v43, %v1149_v10 }
 0x2f7   :  { %1247 = vst.msk [vmem:[%s2288_s7 + $0x150] sm:$0xff] %vm1204_vm2, %v1150_v12  ;;  %1406 = vmatmul.msk.bf16.gmra.mxu3 %vm541_vm1, %v900_v11 }
 0x2f8   :  { %v797_v13 = vpop.f32.mrf.mxu3 }
 0x2f9   :  { %v798_v15 = vadd.f32 %v2077_v62, %v797_v13 }
 0x2fb   :  { %v867_v18 = vmax.f32 %v798_v15, 0.0 }
 0x2fc   :  { %v1151_v34 = vpop.f32.mrf.mxu2 }
 0x2fd   :  { %v1152_v14 = vadd.f32 %v1816_v43, %v1151_v34 }
 0x2ff   :  { %1248 = vst.msk [vmem:[%s2288_s7 + $0x158] sm:$0xff] %vm1204_vm2, %v1152_v14 }
 0x300   :  { %v799_v16 = vpop.f32.mrf.mxu3 }
 0x301   :  { %v800_v17 = vadd.f32 %v2077_v62, %v799_v16 }
 0x303   :  { %v868_v20 = vmax.f32 %v800_v17, 0.0 }
 0x304   :  { %v1154_v21 = vpop.f32.mrf.mxu2 }
 0x305   :  { %v901_v22 = vpack.c.bf16 %v868_v20, %v867_v18  ;;  %v1155_v23 = vadd.f32 %v1816_v43, %v1154_v21 }
 0x307   :  { %1249 = vst.msk [vmem:[%s2288_s7 + $0x160] sm:$0xff] %vm1204_vm2, %v1155_v23  ;;  %1407 = vmatmul.msk.bf16.gmra.mxu3 %vm541_vm1, %v901_v22 }
 0x308   :  { %v802_v24 = vpop.f32.mrf.mxu3 }
 0x309   :  { %v803_v27 = vadd.f32 %v2077_v62, %v802_v24 }
 0x30b   :  { %v869_v30 = vmax.f32 %v803_v27, 0.0 }
 0x30c   :  { %v1156_v25 = vpop.f32.mrf.mxu2 }
 0x30d   :  { %v1157_v26 = vadd.f32 %v1816_v43, %v1156_v25 }
 0x30f   :  { %1250 = vst.msk [vmem:[%s2288_s7 + $0x168] sm:$0xff] %vm1204_vm2, %v1157_v26 }
 0x310   :  { %v804_v28 = vpop.f32.mrf.mxu3 }
 0x311   :  { %v805_v29 = vadd.f32 %v2077_v62, %v804_v28 }
 0x313   :  { %v870_v31 = vmax.f32 %v805_v29, 0.0 }
 0x314   :  { %v1159_v32 = vpop.f32.mrf.mxu2 }
 0x315   :  { %v902_v33 = vpack.c.bf16 %v870_v31, %v869_v30  ;;  %v1160_v36 = vadd.f32 %v1816_v43, %v1159_v32 }
 0x317   :  { %1251 = vst.msk [vmem:[%s2288_s7 + $0x170] sm:$0xff] %vm1204_vm2, %v1160_v36  ;;  %1408 = vmatmul.msk.bf16.gmra.mxu3 %vm541_vm1, %v902_v33 }
 0x31c   :  { %v1161_v37 = vpop.f32.mrf.mxu2 }
 0x31d   :  { %v1162_v38 = vadd.f32 %v1816_v43, %v1161_v37 }
 0x31f   :  { %1252 = vst.msk [vmem:[%s2288_s7 + $0x178] sm:$0xff] %vm1204_vm2, %v1162_v38 }
 0x32a   :  { %v1164_v62 = vpop.f32.mrf.mxu3 }
 0x32b   :  { %v1165_v39 = vadd.f32 %v1816_v43, %v1164_v62 }
 0x32d   :  { %1253 = vst.msk [vmem:[%s2288_s7 + $0x180] sm:$0xff] %vm1204_vm2, %v1165_v39 }
 0x332   :  { %v1166_v40 = vpop.f32.mrf.mxu3 }
 0x333   :  { %v1167_v42 = vadd.f32 %v1816_v43, %v1166_v40 }
 0x335   :  { %1254 = vst.msk [vmem:[%s2288_s7 + $0x188] sm:$0xff] %vm1204_vm2, %v1167_v42 }
 0x33a   :  { %v1169_v46 = vpop.f32.mrf.mxu3 }
 0x33b   :  { %v1170_v47 = vadd.f32 %v1816_v43, %v1169_v46 }
 0x33d   :  { %1255 = vst.msk [vmem:[%s2288_s7 + $0x190] sm:$0xff] %vm1204_vm2, %v1170_v47 }
 0x342   :  { %v1171_v48 = vpop.f32.mrf.mxu3 }
 0x343   :  { %v1172_v49 = vadd.f32 %v1816_v43, %v1171_v48 }
 0x345   :  { %1256 = vst.msk [vmem:[%s2288_s7 + $0x198] sm:$0xff] %vm1204_vm2, %v1172_v49 }
 0x34a   :  { %v1174_v50 = vpop.f32.mrf.mxu3 }
 0x34b   :  { %v1175_v51 = vadd.f32 %v1816_v43, %v1174_v50 }
 0x34d   :  { %1257 = vst.msk [vmem:[%s2288_s7 + $0x1a0] sm:$0xff] %vm1204_vm2, %v1175_v51 }
 0x352   :  { %v1176_v35 = vpop.f32.mrf.mxu3 }
 0x353   :  { %v1177_v52 = vadd.f32 %v1816_v43, %v1176_v35 }
 0x355   :  { %1258 = vst.msk [vmem:[%s2288_s7 + $0x1a8] sm:$0xff] %vm1204_vm2, %v1177_v52 }
 0x35a   :  { %v1179_v53 = vpop.f32.mrf.mxu3 }
 0x35b   :  { %v1180_v41 = vadd.f32 %v1816_v43, %v1179_v53 }
 0x35d   :  { %1259 = vst.msk [vmem:[%s2288_s7 + $0x1b0] sm:$0xff] %vm1204_vm2, %v1180_v41 }
 0x362   :  { %v1181_v54 = vpop.f32.mrf.mxu3 }
 0x363   :  { %v1182_v55 = vadd.f32 %v1816_v43, %v1181_v54 }
 0x365   :  { %1260 = vst.msk [vmem:[%s2288_s7 + $0x1b8] sm:$0xff] %vm1204_vm2, %v1182_v55 }
 0x36a   :  { %v1184_v56 = vpop.f32.mrf.mxu3 }
 0x36b   :  { %v1185_v57 = vadd.f32 %v1816_v43, %v1184_v56 }
 0x36d   :  { %1261 = vst.msk [vmem:[%s2288_s7 + $0x1c0] sm:$0xff] %vm1204_vm2, %v1185_v57 }
 0x372   :  { %v1186_v44 = vpop.f32.mrf.mxu3 }
 0x373   :  { %v1187_v58 = vadd.f32 %v1816_v43, %v1186_v44 }
 0x375   :  { %1262 = vst.msk [vmem:[%s2288_s7 + $0x1c8] sm:$0xff] %vm1204_vm2, %v1187_v58 }
 0x37a   :  { %v1189_v59 = vpop.f32.mrf.mxu3 }
 0x37b   :  { %v1190_v60 = vadd.f32 %v1816_v43, %v1189_v59 }
 0x37d   :  { %1263 = vst.msk [vmem:[%s2288_s7 + $0x1d0] sm:$0xff] %vm1204_vm2, %v1190_v60 }
 0x382   :  { %v1191_v61 = vpop.f32.mrf.mxu3 }
 0x383   :  { %v1192_v19 = vadd.f32 %v1816_v43, %v1191_v61 }
 0x385   :  { %1264 = vst.msk [vmem:[%s2288_s7 + $0x1d8] sm:$0xff] %vm1204_vm2, %v1192_v19 }
 0x38a   :  { %v1194_v1 = vpop.f32.mrf.mxu3 }
 0x38b   :  { %v1195_v63 = vadd.f32 %v1816_v43, %v1194_v1 }
 0x38d   :  { %1265 = vst.msk [vmem:[%s2288_s7 + $0x1e0] sm:$0xff] %vm1204_vm2, %v1195_v63 }
 0x392   :  { %v1196_v0 = vpop.f32.mrf.mxu3 }
 0x393   :  { %v1197_v2 = vadd.f32 %v1816_v43, %v1196_v0 }
 0x395   :  { %1266 = vst.msk [vmem:[%s2288_s7 + $0x1e8] sm:$0xff] %vm1204_vm2, %v1197_v2 }
 0x39a   :  { %v1199_v45 = vpop.f32.mrf.mxu3 }
 0x39b   :  { %v1200_v3 = vadd.f32 %v1816_v43, %v1199_v45 }
 0x39d   :  { %1267 = vst.msk [vmem:[%s2288_s7 + $0x1f0] sm:$0xff] %vm1204_vm2, %v1200_v3 }
 0x3a2   :  { %v1201_v4 = vpop.f32.mrf.mxu3 }
 0x3a3   :  { %v1202_v5 = vadd.f32 %v1816_v43, %v1201_v4 }
 0x3a5   :  { %1268 = vst.msk [vmem:[%s2288_s7 + $0x1f8] sm:$0xff] %vm1204_vm2, %v1202_v5 }

// kernel: _mlp_forward.1
= control target key start
LH: loop header
LB: loop body
LE: loop exit
PB: predicated region body
PF: predicated region fallthrough
CT: control target
= control target key end

     0   :  { %vm143_vm0 = vcmask 261120   ;;  %vm541_vm1 = vcmask 523264   ;;  %vm1204_vm2 = vcmask 130048   ;;  %s2281_s1 = inlined_call_operand.vmem [shape: bf16[32,64], index: 1, kind: input, shape index: {}]   ;;  %s2282_s0 = inlined_call_operand.vmem [shape: f32[512,32], index: 0, kind: input, shape index: {}]   ;;  %s2283_s2 = inlined_call_operand.vmem [shape: f32[1,64], index: 2, kind: input, shape index: {}]   ;;  %s2284_s3 = inlined_call_operand.vmem [shape: bf16[64,64], index: 3, kind: input, shape index: {}]   ;;  %s2285_s4 = inlined_call_operand.vmem [shape: f32[1,64], index: 4, kind: input, shape index: {}]   ;;  %s2286_s5 = inlined_call_operand.vmem [shape: bf16[64,16], index: 5, kind: input, shape index: {}]   ;;  %s2287_s6 = inlined_call_operand.vmem [shape: f32[1,16], index: 6, kind: input, shape index: {}]   ;;  %s2288_s7 = inlined_call_operand.vmem [shape: f32[512,16], index: 7, kind: output, shape index: {}]  }
   0x1   :  { %v1410_v0 = vld [vmem:[%s2281_s1 + $0x8] sm:$0xff]  ;;  %v1409_v1 = vld [vmem:[%s2281_s1] sm:$0xff]  ;;  %v29_v5 = vld [vmem:[%s2282_s0 + $0x10] sm:$0xff] }
   0x2   :  { %246 = vmatpush.bf16.msra.mxu0 %v1410_v0  ;;  %v27_v2 = vld [vmem:[%s2282_s0] sm:$0xff]  ;;  %v28_v3 = vld [vmem:[%s2282_s0 + $0x8] sm:$0xff]  ;;  %1419 = vmatpush.bf16.msra.mxu3 %v1410_v0  ;;  %v30_v6 = vld [vmem:[%s2282_s0 + $0x18] sm:$0xff] }
   0x3   :  { %v91_v4 = vpack.c.bf16 %v28_v3, %v27_v2  ;;  %v92_v7 = vpack.c.bf16 %v30_v6, %v29_v5  ;;  %v31_v8 = vld [vmem:[%s2282_s0 + $0x20] sm:$0xff]  ;;  %v32_v9 = vld [vmem:[%s2282_s0 + $0x28] sm:$0xff]  ;;  %v33_v11 = vld [vmem:[%s2282_s0 + $0x30] sm:$0xff] }
   0x4   :  { %v93_v10 = vpack.c.bf16 %v32_v9, %v31_v8  ;;  %v34_v12 = vld [vmem:[%s2282_s0 + $0x38] sm:$0xff]  ;;  %v35_v14 = vld [vmem:[%s2282_s0 + $0x40] sm:$0xff]  ;;  %v36_v15 = vld [vmem:[%s2282_s0 + $0x48] sm:$0xff] }
   0x5   :  { %v94_v13 = vpack.c.bf16 %v34_v12, %v33_v11  ;;  %v95_v16 = vpack.c.bf16 %v36_v15, %v35_v14  ;;  %v37_v17 = vld [vmem:[%s2282_s0 + $0x50] sm:$0xff]  ;;  %v38_v18 = vld [vmem:[%s2282_s0 + $0x58] sm:$0xff]  ;;  %v39_v20 = vld [vmem:[%s2282_s0 + $0x60] sm:$0xff] }
   0x6   :  { %247 = vmatpush.bf16.msra.mxu0 %v1409_v1  ;;  %1420 = vmatpush.bf16.msra.mxu3 %v1409_v1  ;;  %v96_v19 = vpack.c.bf16 %v38_v18, %v37_v17  ;;  %v40_v21 = vld [vmem:[%s2282_s0 + $0x68] sm:$0xff]  ;;  %v1414_v22 = vld [vmem:[%s2284_s3 + $0x18] sm:$0xff]  ;;  %v1413_v24 = vld [vmem:[%s2284_s3 + $0x10] sm:$0xff] }
   0x7   :  { %v97_v23 = vpack.c.bf16 %v40_v21, %v39_v20  ;;  %642 = vmatpush.bf16.msra.mxu1 %v1414_v22  ;;  %v1412_v25 = vld [vmem:[%s2284_s3 + $0x8] sm:$0xff]  ;;  %v1411_v26 = vld [vmem:[%s2284_s3] sm:$0xff]  ;;  %v41_v27 = vld [vmem:[%s2282_s0 + $0x70] sm:$0xff] }
   0x8   :  { %v42_v28 = vld [vmem:[%s2282_s0 + $0x78] sm:$0xff]  ;;  %v43_v30 = vld [vmem:[%s2282_s0 + $0x80] sm:$0xff]  ;;  %v44_v31 = vld [vmem:[%s2282_s0 + $0x88] sm:$0xff] }
   0x9   :  { %1281 = vmatmul.msk.bf16.vlgmr.msra.gmra.mxu0 %vm143_vm0, %v91_v4  ;;  %v98_v29 = vpack.c.bf16 %v42_v28, %v41_v27  ;;  %v99_v32 = vpack.c.bf16 %v44_v31, %v43_v30  ;;  %v1557_v34 = vld [vmem:[%s2283_s2] ss:$0 sm:$0xff]  ;;  %v45_v40 = vld [vmem:[%s2282_s0 + $0x90] sm:$0xff]  ;;  %v46_v41 = vld [vmem:[%s2282_s0 + $0x98] sm:$0xff] }
   0xa   :  { %1421 = vmatpush.bf16.msrb.mxu3 %v1414_v22  ;;  %v100_v43 = vpack.c.bf16 %v46_v41, %v45_v40  ;;  %v47_v50 = vld [vmem:[%s2282_s0 + $0xa0] sm:$0xff]  ;;  %v48_v51 = vld [vmem:[%s2282_s0 + $0xa8] sm:$0xff]  ;;  %v49_v60 = vld [vmem:[%s2282_s0 + $0xb0] sm:$0xff] }
   0xb   :  { %643 = vmatpush.bf16.msra.mxu1 %v1413_v24  ;;  %v101_v53 = vpack.c.bf16 %v48_v51, %v47_v50  ;;  %v50_v61 = vld [vmem:[%s2282_s0 + $0xb8] sm:$0xff]  ;;  %v51_v6 = vld [vmem:[%s2282_s0 + $0xc0] sm:$0xff]  ;;  %v56_v27 = vld [vmem:[%s2282_s0 + $0xe8] sm:$0xff] }
   0xc   :  { %v102_v63 = vpack.c.bf16 %v50_v61, %v49_v60  ;;  %v54_v17 = vld [vmem:[%s2282_s0 + $0xd8] sm:$0xff]  ;;  %v1637_v41 = vld [vmem:[%s2286_s5 + $0x10] sm:$0xff]  ;;  %v59_v51 = vld [vmem:[%s2282_s0 + $0x100] sm:$0xff] }
   0xe   :  { %1422 = vmatpush.bf16.msrb.mxu3 %v1413_v24 }
   0xf   :  { %644 = vmatpush.bf16.msra.mxu1 %v1412_v25 }
  0x12   :  { %1423 = vmatpush.bf16.msrb.mxu3 %v1412_v25 }
  0x13   :  { %645 = vmatpush.bf16.msra.mxu1 %v1411_v26 }
  0x16   :  { %1424 = vmatpush.bf16.msrb.mxu3 %v1411_v26  ;;  %v55_v26 = vld [vmem:[%s2282_s0 + $0xe0] sm:$0xff] }
  0x19   :  { %1282 = vmatmul.msk.bf16.gmra.mxu0 %vm143_vm0, %v92_v7  ;;  %v52_v7 = vld [vmem:[%s2282_s0 + $0xc8] sm:$0xff] }
  0x1a   :  { %v103_v9 = vpack.c.bf16 %v52_v7, %v51_v6 }
  0x29   :  { %1283 = vmatmul.msk.bf16.gmra.mxu0 %vm143_vm0, %v93_v10 }
  0x39   :  { %1284 = vmatmul.msk.bf16.gmra.mxu0 %vm143_vm0, %v94_v13 }
  0x49   :  { %1285 = vmatmul.msk.bf16.gmra.mxu0 %vm143_vm0, %v95_v16  ;;  %v53_v16 = vld [vmem:[%s2282_s0 + $0xd0] sm:$0xff] }
  0x59   :  { %1286 = vmatmul.msk.bf16.gmra.mxu0 %vm143_vm0, %v96_v19  ;;  %v104_v19 = vpack.c.bf16 %v54_v17, %v53_v16  ;;  %v63_v16 = vld [vmem:[%s2282_s0 + $0x120] sm:$0xff]  ;;  %v64_v17 = vld [vmem:[%s2282_s0 + $0x128] sm:$0xff] }
  0x69   :  { %1287 = vmatmul.msk.bf16.gmra.mxu0 %vm143_vm0, %v97_v23 }
  0x79   :  { %1288 = vmatmul.msk.bf16.gmra.mxu0 %vm143_vm0, %v98_v29  ;;  %v105_v29 = vpack.c.bf16 %v56_v27, %v55_v26 }
  0x86   :  { %v249_v33 = vpop.f32.mrf.mxu0 }
  0x87   :  { %v250_v35 = vadd.f32 %v1557_v34, %v249_v33 }
  0x89   :  { %1289 = vmatmul.msk.bf16.gmra.mxu0 %vm143_vm0, %v99_v32  ;;  %v409_v38 = vmax.f32 %v250_v35, 0.0  ;;  %v1625_v35 = vld [vmem:[%s2286_s5 + $0x18] sm:$0xff] }
  0x8a   :  { %1039 = vmatpush.bf16.msra.mxu2 %v1625_v35 }
  0x8e   :  { %v251_v36 = vpop.f32.mrf.mxu0  ;;  %1040 = vmatpush.bf16.msra.mxu2 %v1637_v41 }
  0x8f   :  { %v252_v37 = vadd.f32 %v1557_v34, %v251_v36 }
  0x91   :  { %v410_v39 = vmax.f32 %v252_v37, 0.0 }
  0x93   :  { %v473_v42 = vpack.c.bf16 %v410_v39, %v409_v38  ;;  %v57_v38 = vld [vmem:[%s2282_s0 + $0xf0] sm:$0xff]  ;;  %v58_v39 = vld [vmem:[%s2282_s0 + $0xf8] sm:$0xff] }
  0x95   :  { %1329 = vmatmul.msk.bf16.vlgmr.msra.gmra.mxu1 %vm541_vm1, %v473_v42  ;;  %v106_v42 = vpack.c.bf16 %v58_v39, %v57_v38 }
  0x96   :  { %v254_v44 = vpop.f32.mrf.mxu0 }
  0x97   :  { %v255_v45 = vadd.f32 %v1557_v34, %v254_v44  ;;  %v1644_v44 = vld [vmem:[%s2286_s5 + $0x8] sm:$0xff] }
  0x98   :  { %1041 = vmatpush.bf16.msra.mxu2 %v1644_v44 }
  0x99   :  { %1290 = vmatmul.msk.bf16.gmra.mxu0 %vm143_vm0, %v100_v43  ;;  %v411_v48 = vmax.f32 %v255_v45, 0.0  ;;  %v1651_v45 = vld [vmem:[%s2286_s5] sm:$0xff] }
  0x9c   :  { %1042 = vmatpush.bf16.msra.mxu2 %v1651_v45 }
  0x9e   :  { %v256_v46 = vpop.f32.mrf.mxu0 }
  0x9f   :  { %v257_v47 = vadd.f32 %v1557_v34, %v256_v46 }
  0xa1   :  { %v412_v49 = vmax.f32 %v257_v47, 0.0 }
  0xa3   :  { %v474_v52 = vpack.c.bf16 %v412_v49, %v411_v48 }
  0xa5   :  { %1330 = vmatmul.msk.bf16.gmra.mxu1 %vm541_vm1, %v474_v52  ;;  %v60_v52 = vld [vmem:[%s2282_s0 + $0x108] sm:$0xff] }
  0xa6   :  { %v259_v54 = vpop.f32.mrf.mxu0 }
  0xa7   :  { %v260_v55 = vadd.f32 %v1557_v34, %v259_v54  ;;  %v107_v54 = vpack.c.bf16 %v60_v52, %v59_v51 }
  0xa9   :  { %1291 = vmatmul.msk.bf16.gmra.mxu0 %vm143_vm0, %v101_v53  ;;  %v413_v58 = vmax.f32 %v260_v55, 0.0 }
  0xae   :  { %v261_v56 = vpop.f32.mrf.mxu0 }
  0xaf   :  { %v262_v57 = vadd.f32 %v1557_v34, %v261_v56 }
  0xb1   :  { %v414_v59 = vmax.f32 %v262_v57, 0.0 }
  0xb3   :  { %v475_v62 = vpack.c.bf16 %v414_v59, %v413_v58 }
  0xb5   :  { %1331 = vmatmul.msk.bf16.gmra.mxu1 %vm541_vm1, %v475_v62  ;;  %v61_v62 = vld [vmem:[%s2282_s0 + $0x110] sm:$0xff] }
  0xb6   :  { %v264_v0 = vpop.f32.mrf.mxu0 }
  0xb7   :  { %v265_v1 = vadd.f32 %v1557_v34, %v264_v0 }
  0xb9   :  { %1292 = vmatmul.msk.bf16.gmra.mxu0 %vm143_vm0, %v102_v63  ;;  %v415_v4 = vmax.f32 %v265_v1, 0.0  ;;  %v62_v63 = vld [vmem:[%s2282_s0 + $0x118] sm:$0xff]  ;;  %v1675_v1 = vld [vmem:[%s2285_s4] ss:$0 sm:$0xff] }
  0xbe   :  { %v266_v2 = vpop.f32.mrf.mxu0 }
  0xbf   :  { %v267_v3 = vadd.f32 %v1557_v34, %v266_v2  ;;  %v108_v2 = vpack.c.bf16 %v62_v63, %v61_v62 }
  0xc1   :  { %v416_v5 = vmax.f32 %v267_v3, 0.0 }
  0xc3   :  { %v476_v8 = vpack.c.bf16 %v416_v5, %v415_v4 }
  0xc5   :  { %1332 = vmatmul.msk.bf16.gmra.mxu1 %vm541_vm1, %v476_v8 }
  0xc6   :  { %v269_v10 = vpop.f32.mrf.mxu0 }
  0xc7   :  { %v270_v11 = vadd.f32 %v1557_v34, %v269_v10 }
  0xc9   :  { %1293 = vmatmul.msk.bf16.gmra.mxu0 %vm143_vm0, %v103_v9  ;;  %v417_v14 = vmax.f32 %v270_v11, 0.0 }
  0xce   :  { %v271_v12 = vpop.f32.mrf.mxu0 }
  0xcf   :  { %v272_v13 = vadd.f32 %v1557_v34, %v271_v12 }
  0xd1   :  { %v418_v15 = vmax.f32 %v272_v13, 0.0 }
  0xd3   :  { %v477_v18 = vpack.c.bf16 %v418_v15, %v417_v14 }
  0xd5   :  { %1333 = vmatmul.msk.bf16.gmra.mxu1 %vm541_vm1, %v477_v18 }
  0xd6   :  { %v274_v20 = vpop.f32.mrf.mxu0 }
  0xd7   :  { %v275_v21 = vadd.f32 %v1557_v34, %v274_v20 }
  0xd9   :  { %1294 = vmatmul.msk.bf16.gmra.mxu0 %vm143_vm0, %v104_v19  ;;  %v419_v24 = vmax.f32 %v275_v21, 0.0  ;;  %v109_v19 = vpack.c.bf16 %v64_v17, %v63_v16 }
  0xde   :  { %v276_v22 = vpop.f32.mrf.mxu0 }
  0xdf   :  { %v277_v23 = vadd.f32 %v1557_v34, %v276_v22 }
  0xe1   :  { %v420_v25 = vmax.f32 %v277_v23, 0.0 }
  0xe3   :  { %v478_v28 = vpack.c.bf16 %v420_v25, %v419_v24 }
  0xe5   :  { %1334 = vmatmul.msk.bf16.gmra.mxu1 %vm541_vm1, %v478_v28 }
  0xe6   :  { %v279_v30 = vpop.f32.mrf.mxu0 }
  0xe7   :  { %v280_v31 = vadd.f32 %v1557_v34, %v279_v30 }
  0xe9   :  { %1295 = vmatmul.msk.bf16.gmra.mxu0 %vm143_vm0, %v105_v29  ;;  %v421_v36 = vmax.f32 %v280_v31, 0.0 }
  0xee   :  { %v281_v32 = vpop.f32.mrf.mxu0 }
  0xef   :  { %v282_v33 = vadd.f32 %v1557_v34, %v281_v32 }
  0xf1   :  { %v422_v37 = vmax.f32 %v282_v33, 0.0  ;;  %v65_v33 = vld [vmem:[%s2282_s0 + $0x130] sm:$0xff] }
  0xf3   :  { %v479_v40 = vpack.c.bf16 %v422_v37, %v421_v36  ;;  %v66_v36 = vld [vmem:[%s2282_s0 + $0x138] sm:$0xff] }
  0xf4   :  { %v110_v38 = vpack.c.bf16 %v66_v36, %v65_v33 }
  0xf5   :  { %1335 = vmatmul.msk.bf16.gmra.mxu1 %vm541_vm1, %v479_v40 }
  0xf6   :  { %v284_v43 = vpop.f32.mrf.mxu0 }
  0xf7   :  { %v285_v46 = vadd.f32 %v1557_v34, %v284_v43 }
  0xf9   :  { %1296 = vmatmul.msk.bf16.gmra.mxu0 %vm143_vm0, %v106_v42  ;;  %v423_v49 = vmax.f32 %v285_v46, 0.0 }
  0xfe   :  { %v286_v47 = vpop.f32.mrf.mxu0 }
  0xff   :  { %v287_v48 = vadd.f32 %v1557_v34, %v286_v47 }
 0x101   :  { %v424_v50 = vmax.f32 %v287_v48, 0.0 }
 0x103   :  { %v480_v53 = vpack.c.bf16 %v424_v50, %v423_v49 }
 0x105   :  { %1336 = vmatmul.msk.bf16.gmra.mxu1 %vm541_vm1, %v480_v53 }
 0x106   :  { %v289_v55 = vpop.f32.mrf.mxu0 }
 0x107   :  { %v290_v56 = vadd.f32 %v1557_v34, %v289_v55  ;;  %v67_v55 = vld [vmem:[%s2282_s0 + $0x140] sm:$0xff] }
 0x109   :  { %1297 = vmatmul.msk.bf16.gmra.mxu0 %vm143_vm0, %v107_v54  ;;  %v425_v59 = vmax.f32 %v290_v56, 0.0  ;;  %v68_v56 = vld [vmem:[%s2282_s0 + $0x148] sm:$0xff] }
 0x10e   :  { %v291_v57 = vpop.f32.mrf.mxu0 }
 0x10f   :  { %v292_v58 = vadd.f32 %v1557_v34, %v291_v57 }
 0x111   :  { %v426_v60 = vmax.f32 %v292_v58, 0.0  ;;  %v111_v58 = vpack.c.bf16 %v68_v56, %v67_v55  ;;  %v80_v55 = vld [vmem:[%s2282_s0 + $0x1a8] sm:$0xff] }
 0x112   :  { %v647_v61 = vpop.f32.mrf.mxu1 }
 0x113   :  { %v481_v0 = vpack.c.bf16 %v426_v60, %v425_v59  ;;  %v648_v4 = vadd.f32 %v1675_v1, %v647_v61 }
 0x115   :  { %1337 = vmatmul.msk.bf16.gmra.mxu1 %vm541_vm1, %v481_v0  ;;  %v807_v7 = vmax.f32 %v648_v4, 0.0 }
 0x116   :  { %v294_v3 = vpop.f32.mrf.mxu0 }
 0x117   :  { %v295_v8 = vadd.f32 %v1557_v34, %v294_v3 }
 0x119   :  { %1298 = vmatmul.msk.bf16.gmra.mxu0 %vm143_vm0, %v108_v2  ;;  %v427_v13 = vmax.f32 %v295_v8, 0.0 }
 0x11a   :  { %v649_v5 = vpop.f32.mrf.mxu1 }
 0x11b   :  { %v650_v6 = vadd.f32 %v1675_v1, %v649_v5 }
 0x11d   :  { %v808_v9 = vmax.f32 %v650_v6, 0.0 }
 0x11e   :  { %v296_v10 = vpop.f32.mrf.mxu0 }
 0x11f   :  { %v297_v11 = vadd.f32 %v1557_v34, %v296_v10  ;;  %v871_v12 = vpack.c.bf16 %v808_v9, %v807_v7  ;;  %v69_v9 = vld [vmem:[%s2282_s0 + $0x150] sm:$0xff]  ;;  %v70_v10 = vld [vmem:[%s2282_s0 + $0x158] sm:$0xff] }
 0x121   :  { %v428_v14 = vmax.f32 %v297_v11, 0.0  ;;  %1377 = vmatmul.msk.bf16.vlgmr.msra.gmra.mxu2 %vm541_vm1, %v871_v12  ;;  %v112_v12 = vpack.c.bf16 %v70_v10, %v69_v9  ;;  %v81_v9 = vld [vmem:[%s2282_s0 + $0x1b0] sm:$0xff]  ;;  %v82_v10 = vld [vmem:[%s2282_s0 + $0x1b8] sm:$0xff] }
 0x122   :  { %v652_v15 = vpop.f32.mrf.mxu1 }
 0x123   :  { %v482_v18 = vpack.c.bf16 %v428_v14, %v427_v13  ;;  %v653_v21 = vadd.f32 %v1675_v1, %v652_v15 }
 0x125   :  { %1338 = vmatmul.msk.bf16.gmra.mxu1 %vm541_vm1, %v482_v18  ;;  %v809_v24 = vmax.f32 %v653_v21, 0.0 }
 0x126   :  { %v299_v20 = vpop.f32.mrf.mxu0 }
 0x127   :  { %v300_v25 = vadd.f32 %v1557_v34, %v299_v20 }
 0x129   :  { %1299 = vmatmul.msk.bf16.gmra.mxu0 %vm143_vm0, %v109_v19  ;;  %v429_v30 = vmax.f32 %v300_v25, 0.0 }
 0x12a   :  { %v654_v22 = vpop.f32.mrf.mxu1 }
 0x12b   :  { %v655_v23 = vadd.f32 %v1675_v1, %v654_v22 }
 0x12d   :  { %v810_v26 = vmax.f32 %v655_v23, 0.0 }
 0x12e   :  { %v301_v27 = vpop.f32.mrf.mxu0 }
 0x12f   :  { %v302_v28 = vadd.f32 %v1557_v34, %v301_v27  ;;  %v872_v29 = vpack.c.bf16 %v810_v26, %v809_v24  ;;  %v71_v26 = vld [vmem:[%s2282_s0 + $0x160] sm:$0xff]  ;;  %v72_v27 = vld [vmem:[%s2282_s0 + $0x168] sm:$0xff] }
 0x131   :  { %v430_v31 = vmax.f32 %v302_v28, 0.0  ;;  %1378 = vmatmul.msk.bf16.gmra.mxu2 %vm541_vm1, %v872_v29  ;;  %v113_v29 = vpack.c.bf16 %v72_v27, %v71_v26  ;;  %v83_v26 = vld [vmem:[%s2282_s0 + $0x1c0] sm:$0xff]  ;;  %v84_v27 = vld [vmem:[%s2282_s0 + $0x1c8] sm:$0xff] }
 0x132   :  { %v657_v32 = vpop.f32.mrf.mxu1 }
 0x133   :  { %v483_v37 = vpack.c.bf16 %v430_v31, %v429_v30  ;;  %v658_v40 = vadd.f32 %v1675_v1, %v657_v32  ;;  %v77_v31 = vld [vmem:[%s2282_s0 + $0x190] sm:$0xff]  ;;  %v78_v32 = vld [vmem:[%s2282_s0 + $0x198] sm:$0xff] }
 0x134   :  { %v116_v36 = vpack.c.bf16 %v78_v32, %v77_v31 }
 0x135   :  { %1339 = vmatmul.msk.bf16.gmra.mxu1 %vm541_vm1, %v483_v37  ;;  %v811_v46 = vmax.f32 %v658_v40, 0.0 }
 0x136   :  { %v304_v39 = vpop.f32.mrf.mxu0  ;;  %1306 = vmatmul.msk.bf16.vlgmr.msra.gmra.mxu3 %vm143_vm0, %v116_v36 }
 0x137   :  { %v305_v47 = vadd.f32 %v1557_v34, %v304_v39  ;;  %1425 = vmatpush.bf16.msra.mxu3 %v1625_v35  ;;  %v74_v35 = vld [vmem:[%s2282_s0 + $0x178] sm:$0xff] }
 0x139   :  { %1300 = vmatmul.msk.bf16.gmra.mxu0 %vm143_vm0, %v110_v38  ;;  %v431_v52 = vmax.f32 %v305_v47, 0.0 }
 0x13a   :  { %v659_v42 = vpop.f32.mrf.mxu1 }
 0x13b   :  { %v660_v43 = vadd.f32 %v1675_v1, %v659_v42  ;;  %1426 = vmatpush.bf16.msra.mxu3 %v1637_v41 }
 0x13d   :  { %v812_v48 = vmax.f32 %v660_v43, 0.0 }
 0x13e   :  { %v306_v49 = vpop.f32.mrf.mxu0 }
 0x13f   :  { %v307_v50 = vadd.f32 %v1557_v34, %v306_v49  ;;  %v873_v51 = vpack.c.bf16 %v812_v48, %v811_v46  ;;  %1427 = vmatpush.bf16.msra.mxu3 %v1644_v44 }
 0x141   :  { %v432_v53 = vmax.f32 %v307_v50, 0.0  ;;  %1379 = vmatmul.msk.bf16.gmra.mxu2 %vm541_vm1, %v873_v51  ;;  %v73_v51 = vld [vmem:[%s2282_s0 + $0x170] sm:$0xff] }
 0x142   :  { %v662_v54 = vpop.f32.mrf.mxu1 }
 0x143   :  { %v484_v57 = vpack.c.bf16 %v432_v53, %v431_v52  ;;  %v663_v60 = vadd.f32 %v1675_v1, %v662_v54  ;;  %v114_v53 = vpack.c.bf16 %v74_v35, %v73_v51  ;;  %v79_v54 = vld [vmem:[%s2282_s0 + $0x1a0] sm:$0xff]  ;;  %1428 = vmatpush.bf16.msra.mxu3 %v1651_v45  ;;  %v85_v51 = vld [vmem:[%s2282_s0 + $0x1d0] sm:$0xff]  ;;  %v86_v35 = vld [vmem:[%s2282_s0 + $0x1d8] sm:$0xff] }
 0x145   :  { %1340 = vmatmul.msk.bf16.gmra.mxu1 %vm541_vm1, %v484_v57  ;;  %v813_v63 = vmax.f32 %v663_v60, 0.0  ;;  %v117_v57 = vpack.c.bf16 %v80_v55, %v79_v54 }
 0x146   :  { %v309_v59 = vpop.f32.mrf.mxu0 }
 0x147   :  { %v310_v0 = vadd.f32 %v1557_v34, %v309_v59  ;;  %1307 = vmatmul.msk.bf16.gmra.mxu3 %vm143_vm0, %v117_v57 }
 0x149   :  { %1301 = vmatmul.msk.bf16.gmra.mxu0 %vm143_vm0, %v111_v58  ;;  %v433_v6 = vmax.f32 %v310_v0, 0.0 }
 0x14a   :  { %v664_v61 = vpop.f32.mrf.mxu1 }
 0x14b   :  { %v665_v62 = vadd.f32 %v1675_v1, %v664_v61 }
 0x14d   :  { %v814_v2 = vmax.f32 %v665_v62, 0.0 }
 0x14e   :  { %v311_v3 = vpop.f32.mrf.mxu0 }
 0x14f   :  { %v312_v4 = vadd.f32 %v1557_v34, %v311_v3  ;;  %v874_v5 = vpack.c.bf16 %v814_v2, %v813_v63 }
 0x151   :  { %v434_v7 = vmax.f32 %v312_v4, 0.0  ;;  %1380 = vmatmul.msk.bf16.gmra.mxu2 %vm541_vm1, %v874_v5  ;;  %v75_v4 = vld [vmem:[%s2282_s0 + $0x180] sm:$0xff]  ;;  %v76_v5 = vld [vmem:[%s2282_s0 + $0x188] sm:$0xff] }
 0x152   :  { %v667_v8 = vpop.f32.mrf.mxu1 }
 0x153   :  { %v485_v11 = vpack.c.bf16 %v434_v7, %v433_v6  ;;  %v668_v14 = vadd.f32 %v1675_v1, %v667_v8  ;;  %v115_v7 = vpack.c.bf16 %v76_v5, %v75_v4  ;;  %v87_v5 = vld [vmem:[%s2282_s0 + $0x1e0] sm:$0xff] }
 0x155   :  { %1341 = vmatmul.msk.bf16.gmra.mxu1 %vm541_vm1, %v485_v11  ;;  %v815_v17 = vmax.f32 %v668_v14, 0.0 }
 0x156   :  { %v314_v13 = vpop.f32.mrf.mxu0 }
 0x157   :  { %v315_v18 = vadd.f32 %v1557_v34, %v314_v13 }
 0x159   :  { %1302 = vmatmul.msk.bf16.gmra.mxu0 %vm143_vm0, %v112_v12  ;;  %v435_v23 = vmax.f32 %v315_v18, 0.0  ;;  %v118_v12 = vpack.c.bf16 %v82_v10, %v81_v9 }
 0x15a   :  { %v669_v15 = vpop.f32.mrf.mxu1 }
 0x15b   :  { %v670_v16 = vadd.f32 %v1675_v1, %v669_v15  ;;  %1308 = vmatmul.msk.bf16.gmra.mxu3 %vm143_vm0, %v118_v12 }
 0x15d   :  { %v816_v19 = vmax.f32 %v670_v16, 0.0 }
 0x15e   :  { %v316_v20 = vpop.f32.mrf.mxu0 }
 0x15f   :  { %v317_v21 = vadd.f32 %v1557_v34, %v316_v20  ;;  %v875_v22 = vpack.c.bf16 %v816_v19, %v815_v17 }
 0x161   :  { %v436_v24 = vmax.f32 %v317_v21, 0.0  ;;  %1381 = vmatmul.msk.bf16.gmra.mxu2 %vm541_vm1, %v875_v22 }
 0x162   :  { %v672_v25 = vpop.f32.mrf.mxu1 }
 0x163   :  { %v486_v28 = vpack.c.bf16 %v436_v24, %v435_v23  ;;  %v673_v33 = vadd.f32 %v1675_v1, %v672_v25 }
 0x165   :  { %1342 = vmatmul.msk.bf16.gmra.mxu1 %vm541_vm1, %v486_v28  ;;  %v817_v39 = vmax.f32 %v673_v33, 0.0 }
 0x166   :  { %v319_v30 = vpop.f32.mrf.mxu0 }
 0x167   :  { %v320_v40 = vadd.f32 %v1557_v34, %v319_v30 }
 0x169   :  { %1303 = vmatmul.msk.bf16.gmra.mxu0 %vm143_vm0, %v113_v29  ;;  %v437_v48 = vmax.f32 %v320_v40, 0.0  ;;  %v119_v29 = vpack.c.bf16 %v84_v27, %v83_v26  ;;  %v89_v26 = vld [vmem:[%s2282_s0 + $0x1f0] sm:$0xff]  ;;  %v90_v27 = vld [vmem:[%s2282_s0 + $0x1f8] sm:$0xff] }
 0x16a   :  { %v674_v37 = vpop.f32.mrf.mxu1 }
 0x16b   :  { %v675_v38 = vadd.f32 %v1675_v1, %v674_v37  ;;  %1309 = vmatmul.msk.bf16.gmra.mxu3 %vm143_vm0, %v119_v29  ;;  %v122_v29 = vpack.c.bf16 %v90_v27, %v89_v26 }
 0x16d   :  { %v818_v42 = vmax.f32 %v675_v38, 0.0 }
 0x16e   :  { %v321_v43 = vpop.f32.mrf.mxu0 }
 0x16f   :  { %v322_v46 = vadd.f32 %v1557_v34, %v321_v43  ;;  %v876_v47 = vpack.c.bf16 %v818_v42, %v817_v39  ;;  %v1816_v43 = vld [vmem:[%s2287_s6] ss:$0 sm:$0xff] }
 0x171   :  { %v438_v49 = vmax.f32 %v322_v46, 0.0  ;;  %1382 = vmatmul.msk.bf16.gmra.mxu2 %vm541_vm1, %v876_v47 }
 0x172   :  { %v677_v50 = vpop.f32.mrf.mxu1 }
 0x173   :  { %v487_v52 = vpack.c.bf16 %v438_v49, %v437_v48  ;;  %v678_v56 = vadd.f32 %v1675_v1, %v677_v50 }
 0x175   :  { %1343 = vmatmul.msk.bf16.gmra.mxu1 %vm541_vm1, %v487_v52  ;;  %v819_v59 = vmax.f32 %v678_v56, 0.0 }
 0x176   :  { %v324_v41 = vpop.f32.mrf.mxu0 }
 0x177   :  { %v325_v60 = vadd.f32 %v1557_v34, %v324_v41 }
 0x179   :  { %1304 = vmatmul.msk.bf16.gmra.mxu0 %vm143_vm0, %v114_v53  ;;  %v439_v2 = vmax.f32 %v325_v60, 0.0  ;;  %v120_v53 = vpack.c.bf16 %v86_v35, %v85_v51 }
 0x17a   :  { %v679_v44 = vpop.f32.mrf.mxu1 }
 0x17b   :  { %v680_v58 = vadd.f32 %v1675_v1, %v679_v44  ;;  %1310 = vmatmul.msk.bf16.gmra.mxu3 %vm143_vm0, %v120_v53 }
 0x17d   :  { %v820_v61 = vmax.f32 %v680_v58, 0.0 }
 0x17e   :  { %v326_v62 = vpop.f32.mrf.mxu0 }
 0x17f   :  { %v327_v63 = vadd.f32 %v1557_v34, %v326_v62  ;;  %v877_v0 = vpack.c.bf16 %v820_v61, %v819_v59 }
 0x181   :  { %v440_v45 = vmax.f32 %v327_v63, 0.0  ;;  %1383 = vmatmul.msk.bf16.gmra.mxu2 %vm541_vm1, %v877_v0 }
 0x182   :  { %v682_v3 = vpop.f32.mrf.mxu1 }
 0x183   :  { %v488_v6 = vpack.c.bf16 %v440_v45, %v439_v2  ;;  %v683_v11 = vadd.f32 %v1675_v1, %v682_v3 }
 0x185   :  { %1344 = vmatmul.msk.bf16.gmra.mxu1 %vm541_vm1, %v488_v6  ;;  %v821_v15 = vmax.f32 %v683_v11, 0.0  ;;  %v88_v6 = vld [vmem:[%s2282_s0 + $0x1e8] sm:$0xff] }
 0x186   :  { %v329_v8 = vpop.f32.mrf.mxu0 }
 0x187   :  { %v330_v16 = vadd.f32 %v1557_v34, %v329_v8  ;;  %v121_v8 = vpack.c.bf16 %v88_v6, %v87_v5 }
 0x189   :  { %1305 = vmatmul.msk.bf16.gmra.mxu0 %vm143_vm0, %v115_v7  ;;  %v441_v21 = vmax.f32 %v330_v16, 0.0 }
 0x18a   :  { %v684_v13 = vpop.f32.mrf.mxu1 }
 0x18b   :  { %v685_v14 = vadd.f32 %v1675_v1, %v684_v13  ;;  %1311 = vmatmul.msk.bf16.gmra.mxu3 %vm143_vm0, %v121_v8 }
 0x18d   :  { %v822_v17 = vmax.f32 %v685_v14, 0.0 }
 0x18e   :  { %v331_v18 = vpop.f32.mrf.mxu0 }
 0x18f   :  { %v332_v19 = vadd.f32 %v1557_v34, %v331_v18  ;;  %v878_v20 = vpack.c.bf16 %v822_v17, %v821_v15 }
 0x191   :  { %v442_v22 = vmax.f32 %v332_v19, 0.0  ;;  %1384 = vmatmul.msk.bf16.gmra.mxu2 %vm541_vm1, %v878_v20 }
 0x192   :  { %v687_v23 = vpop.f32.mrf.mxu1 }
 0x193   :  { %v489_v24 = vpack.c.bf16 %v442_v22, %v441_v21  ;;  %v688_v28 = vadd.f32 %v1675_v1, %v687_v23 }
 0x195   :  { %1345 = vmatmul.msk.bf16.gmra.mxu1 %vm541_vm1, %v489_v24  ;;  %v823_v32 = vmax.f32 %v688_v28, 0.0 }
 0x196   :  { %v334_v25 = vpop.f32.mrf.mxu0 }
 0x197   :  { %v335_v33 = vadd.f32 %v1557_v34, %v334_v25 }
 0x199   :  { %v443_v40 = vmax.f32 %v335_v33, 0.0 }
 0x19a   :  { %v689_v30 = vpop.f32.mrf.mxu1 }
 0x19b   :  { %v690_v31 = vadd.f32 %v1675_v1, %v689_v30  ;;  %1312 = vmatmul.msk.bf16.gmra.mxu3 %vm143_vm0, %v122_v29 }
 0x19d   :  { %v824_v36 = vmax.f32 %v690_v31, 0.0 }
 0x19e   :  { %v336_v37 = vpop.f32.mrf.mxu0 }
 0x19f   :  { %v337_v38 = vadd.f32 %v1557_v34, %v336_v37  ;;  %v879_v39 = vpack.c.bf16 %v824_v36, %v823_v32 }
 0x1a1   :  { %v444_v42 = vmax.f32 %v337_v38, 0.0  ;;  %1385 = vmatmul.msk.bf16.gmra.mxu2 %vm541_vm1, %v879_v39 }
 0x1a2   :  { %v692_v46 = vpop.f32.mrf.mxu1 }
 0x1a3   :  { %v490_v47 = vpack.c.bf16 %v444_v42, %v443_v40  ;;  %v693_v52 = vadd.f32 %v1675_v1, %v692_v46 }
 0x1a4   :  { %v1044_v48 = vpop.f32.mrf.mxu2 }
 0x1a5   :  { %v1045_v49 = vadd.f32 %v1816_v43, %v1044_v48  ;;  %1346 = vmatmul.msk.bf16.gmra.mxu1 %vm541_vm1, %v490_v47  ;;  %v825_v56 = vmax.f32 %v693_v52, 0.0 }
 0x1a6   :  { %v339_v50 = vpop.f32.mrf.mxu0 }
 0x1a7   :  { %1205 = vst.msk [vmem:[%s2288_s7] sm:$0xff] %vm1204_vm2, %v1045_v49  ;;  %v340_v57 = vadd.f32 %v1557_v34, %v339_v50 }
 0x1a9   :  { %v445_v62 = vmax.f32 %v340_v57, 0.0 }
 0x1aa   :  { %v694_v41 = vpop.f32.mrf.mxu1 }
 0x1ab   :  { %v695_v54 = vadd.f32 %v1675_v1, %v694_v41 }
 0x1ac   :  { %v1046_v55 = vpop.f32.mrf.mxu2 }
 0x1ad   :  { %v826_v44 = vmax.f32 %v695_v54, 0.0  ;;  %v1047_v58 = vadd.f32 %v1816_v43, %v1046_v55 }
 0x1ae   :  { %v341_v59 = vpop.f32.mrf.mxu0 }
 0x1af   :  { %1206 = vst.msk [vmem:[%s2288_s7 + $0x8] sm:$0xff] %vm1204_vm2, %v1047_v58  ;;  %v342_v60 = vadd.f32 %v1557_v34, %v341_v59  ;;  %v880_v61 = vpack.c.bf16 %v826_v44, %v825_v56 }
 0x1b1   :  { %v446_v63 = vmax.f32 %v342_v60, 0.0  ;;  %1386 = vmatmul.msk.bf16.gmra.mxu2 %vm541_vm1, %v880_v61 }
 0x1b2   :  { %v697_v0 = vpop.f32.mrf.mxu1 }
 0x1b3   :  { %v491_v2 = vpack.c.bf16 %v446_v63, %v445_v62  ;;  %v698_v7 = vadd.f32 %v1675_v1, %v697_v0 }
 0x1b4   :  { %v1049_v45 = vpop.f32.mrf.mxu2 }
 0x1b5   :  { %v1050_v3 = vadd.f32 %v1816_v43, %v1049_v45  ;;  %1347 = vmatmul.msk.bf16.gmra.mxu1 %vm541_vm1, %v491_v2  ;;  %v827_v12 = vmax.f32 %v698_v7, 0.0 }
 0x1b6   :  { %v344_v4 = vpop.f32.mrf.mxu0 }
 0x1b7   :  { %1207 = vst.msk [vmem:[%s2288_s7 + $0x10] sm:$0xff] %vm1204_vm2, %v1050_v3  ;;  %v345_v13 = vadd.f32 %v1557_v34, %v344_v4 }
 0x1b9   :  { %v447_v19 = vmax.f32 %v345_v13, 0.0 }
 0x1ba   :  { %v699_v9 = vpop.f32.mrf.mxu1 }
 0x1bb   :  { %v700_v10 = vadd.f32 %v1675_v1, %v699_v9 }
 0x1bc   :  { %v1051_v11 = vpop.f32.mrf.mxu2 }
 0x1bd   :  { %v828_v14 = vmax.f32 %v700_v10, 0.0  ;;  %v1052_v15 = vadd.f32 %v1816_v43, %v1051_v11 }
 0x1be   :  { %v346_v16 = vpop.f32.mrf.mxu0 }
 0x1bf   :  { %1208 = vst.msk [vmem:[%s2288_s7 + $0x18] sm:$0xff] %vm1204_vm2, %v1052_v15  ;;  %v347_v17 = vadd.f32 %v1557_v34, %v346_v16  ;;  %v881_v18 = vpack.c.bf16 %v828_v14, %v827_v12 }
 0x1c1   :  { %v448_v20 = vmax.f32 %v347_v17, 0.0  ;;  %1387 = vmatmul.msk.bf16.gmra.mxu2 %vm541_vm1, %v881_v18 }
 0x1c2   :  { %v702_v21 = vpop.f32.mrf.mxu1 }
 0x1c3   :  { %v492_v22 = vpack.c.bf16 %v448_v20, %v447_v19  ;;  %v703_v28 = vadd.f32 %v1675_v1, %v702_v21 }
 0x1c4   :  { %v1054_v23 = vpop.f32.mrf.mxu2 }
 0x1c5   :  { %v1055_v24 = vadd.f32 %v1816_v43, %v1054_v23  ;;  %1348 = vmatmul.msk.bf16.gmra.mxu1 %vm541_vm1, %v492_v22  ;;  %v829_v33 = vmax.f32 %v703_v28, 0.0  ;;  %v374_v22 = vpop.f32.mrf.mxu3 }
 0x1c6   :  { %v349_v25 = vpop.f32.mrf.mxu0 }
 0x1c7   :  { %1209 = vst.msk [vmem:[%s2288_s7 + $0x20] sm:$0xff] %vm1204_vm2, %v1055_v24  ;;  %v350_v36 = vadd.f32 %v1557_v34, %v349_v25 }
 0x1c9   :  { %v449_v46 = vmax.f32 %v350_v36, 0.0 }
 0x1ca   :  { %v704_v30 = vpop.f32.mrf.mxu1 }
 0x1cb   :  { %v705_v31 = vadd.f32 %v1675_v1, %v704_v30 }
 0x1cc   :  { %v1056_v32 = vpop.f32.mrf.mxu2 }
 0x1cd   :  { %v830_v37 = vmax.f32 %v705_v31, 0.0  ;;  %v1057_v38 = vadd.f32 %v1816_v43, %v1056_v32  ;;  %v376_v36 = vpop.f32.mrf.mxu3 }
 0x1ce   :  { %v351_v39 = vpop.f32.mrf.mxu0 }
 0x1cf   :  { %1210 = vst.msk [vmem:[%s2288_s7 + $0x28] sm:$0xff] %vm1204_vm2, %v1057_v38  ;;  %v352_v40 = vadd.f32 %v1557_v34, %v351_v39  ;;  %v882_v42 = vpack.c.bf16 %v830_v37, %v829_v33 }
 0x1d1   :  { %v450_v47 = vmax.f32 %v352_v40, 0.0  ;;  %1388 = vmatmul.msk.bf16.gmra.mxu2 %vm541_vm1, %v882_v42 }
 0x1d2   :  { %v707_v48 = vpop.f32.mrf.mxu1 }
 0x1d3   :  { %v493_v49 = vpack.c.bf16 %v450_v47, %v449_v46  ;;  %v708_v52 = vadd.f32 %v1675_v1, %v707_v48 }
 0x1d4   :  { %v1059_v50 = vpop.f32.mrf.mxu2 }
 0x1d5   :  { %v1060_v51 = vadd.f32 %v1816_v43, %v1059_v50  ;;  %1349 = vmatmul.msk.bf16.gmra.mxu1 %vm541_vm1, %v493_v49  ;;  %v831_v55 = vmax.f32 %v708_v52, 0.0  ;;  %v379_v50 = vpop.f32.mrf.mxu3 }
 0x1d6   :  { %v354_v35 = vpop.f32.mrf.mxu0 }
 0x1d7   :  { %1211 = vst.msk [vmem:[%s2288_s7 + $0x30] sm:$0xff] %vm1204_vm2, %v1060_v51  ;;  %v355_v56 = vadd.f32 %v1557_v34, %v354_v35 }
 0x1d9   :  { %v451_v61 = vmax.f32 %v355_v56, 0.0 }
 0x1da   :  { %v709_v53 = vpop.f32.mrf.mxu1 }
 0x1db   :  { %v710_v41 = vadd.f32 %v1675_v1, %v709_v53 }
 0x1dc   :  { %v1061_v54 = vpop.f32.mrf.mxu2 }
 0x1dd   :  { %v832_v57 = vmax.f32 %v710_v41, 0.0  ;;  %v1062_v44 = vadd.f32 %v1816_v43, %v1061_v54 }
 0x1de   :  { %v356_v58 = vpop.f32.mrf.mxu0 }
 0x1df   :  { %v883_v59 = vpack.c.bf16 %v832_v57, %v831_v55  ;;  %1212 = vst.msk [vmem:[%s2288_s7 + $0x38] sm:$0xff] %vm1204_vm2, %v1062_v44  ;;  %v357_v60 = vadd.f32 %v1557_v34, %v356_v58 }
 0x1e1   :  { %v452_v62 = vmax.f32 %v357_v60, 0.0  ;;  %1389 = vmatmul.msk.bf16.gmra.mxu2 %vm541_vm1, %v883_v59 }
 0x1e2   :  { %v712_v63 = vpop.f32.mrf.mxu1 }
 0x1e3   :  { %v494_v0 = vpack.c.bf16 %v452_v62, %v451_v61  ;;  %v713_v4 = vadd.f32 %v1675_v1, %v712_v63  ;;  %v381_v62 = vpop.f32.mrf.mxu3 }
 0x1e4   :  { %v1064_v2 = vpop.f32.mrf.mxu2 }
 0x1e5   :  { %v1065_v45 = vadd.f32 %v1816_v43, %v1064_v2  ;;  %1350 = vmatmul.msk.bf16.gmra.mxu1 %vm541_vm1, %v494_v0  ;;  %v833_v8 = vmax.f32 %v713_v4, 0.0 }
 0x1e6   :  { %v359_v3 = vpop.f32.mrf.mxu0 }
 0x1e7   :  { %1213 = vst.msk [vmem:[%s2288_s7 + $0x40] sm:$0xff] %vm1204_vm2, %v1065_v45  ;;  %v360_v9 = vadd.f32 %v1557_v34, %v359_v3  ;;  %v375_v45 = vadd.f32 %v1557_v34, %v374_v22  ;;  %v377_v3 = vadd.f32 %v1557_v34, %v376_v36 }
 0x1e9   :  { %v453_v15 = vmax.f32 %v360_v9, 0.0 }
 0x1ea   :  { %v714_v5 = vpop.f32.mrf.mxu1 }
 0x1eb   :  { %v715_v6 = vadd.f32 %v1675_v1, %v714_v5  ;;  %v384_v9 = vpop.f32.mrf.mxu3 }
 0x1ec   :  { %v1066_v7 = vpop.f32.mrf.mxu2 }
 0x1ed   :  { %v834_v10 = vmax.f32 %v715_v6, 0.0  ;;  %v1067_v11 = vadd.f32 %v1816_v43, %v1066_v7 }
 0x1ee   :  { %v361_v12 = vpop.f32.mrf.mxu0 }
 0x1ef   :  { %v884_v13 = vpack.c.bf16 %v834_v10, %v833_v8  ;;  %1214 = vst.msk [vmem:[%s2288_s7 + $0x48] sm:$0xff] %vm1204_vm2, %v1067_v11  ;;  %v362_v14 = vadd.f32 %v1557_v34, %v361_v12  ;;  %v459_v10 = vmax.f32 %v375_v45, 0.0  ;;  %v460_v11 = vmax.f32 %v377_v3, 0.0 }
 0x1f1   :  { %v454_v16 = vmax.f32 %v362_v14, 0.0  ;;  %1390 = vmatmul.msk.bf16.gmra.mxu2 %vm541_vm1, %v884_v13 }
 0x1f2   :  { %v717_v17 = vpop.f32.mrf.mxu1 }
 0x1f3   :  { %v495_v18 = vpack.c.bf16 %v454_v16, %v453_v15  ;;  %v718_v23 = vadd.f32 %v1675_v1, %v717_v17  ;;  %v386_v16 = vpop.f32.mrf.mxu3 }
 0x1f4   :  { %v1069_v19 = vpop.f32.mrf.mxu2 }
 0x1f5   :  { %v1070_v20 = vadd.f32 %v1816_v43, %v1069_v19  ;;  %1351 = vmatmul.msk.bf16.gmra.mxu1 %vm541_vm1, %v495_v18  ;;  %v835_v27 = vmax.f32 %v718_v23, 0.0  ;;  %v1977_v19 = vld [vmem:[%s2283_s2] ss:$0 sm:$0xff] }
 0x1f6   :  { %v364_v21 = vpop.f32.mrf.mxu0 }
 0x1f7   :  { %1215 = vst.msk [vmem:[%s2288_s7 + $0x50] sm:$0xff] %vm1204_vm2, %v1070_v20  ;;  %v365_v28 = vadd.f32 %v1557_v34, %v364_v21  ;;  %v380_v20 = vadd.f32 %v1977_v19, %v379_v50  ;;  %v382_v21 = vadd.f32 %v1977_v19, %v381_v62 }
 0x1f9   :  { %v455_v37 = vmax.f32 %v365_v28, 0.0  ;;  %v462_v28 = vmax.f32 %v382_v21, 0.0 }
 0x1fa   :  { %v719_v24 = vpop.f32.mrf.mxu1 }
 0x1fb   :  { %v720_v25 = vadd.f32 %v1675_v1, %v719_v24 }
 0x1fc   :  { %v1071_v26 = vpop.f32.mrf.mxu2 }
 0x1fd   :  { %v836_v29 = vmax.f32 %v720_v25, 0.0  ;;  %v1072_v30 = vadd.f32 %v1816_v43, %v1071_v26 }
 0x1fe   :  { %v366_v31 = vpop.f32.mrf.mxu0 }
 0x1ff   :  { %v885_v32 = vpack.c.bf16 %v836_v29, %v835_v27  ;;  %1216 = vst.msk [vmem:[%s2288_s7 + $0x58] sm:$0xff] %vm1204_vm2, %v1072_v30  ;;  %v367_v33 = vadd.f32 %v1557_v34, %v366_v31  ;;  %v461_v27 = vmax.f32 %v380_v20, 0.0  ;;  %v389_v31 = vpop.f32.mrf.mxu3 }
 0x201   :  { %v456_v38 = vmax.f32 %v367_v33, 0.0  ;;  %1391 = vmatmul.msk.bf16.gmra.mxu2 %vm541_vm1, %v885_v32  ;;  %v499_v32 = vpack.c.bf16 %v462_v28, %v461_v27 }
 0x202   :  { %v722_v39 = vpop.f32.mrf.mxu1 }
 0x203   :  { %v496_v40 = vpack.c.bf16 %v456_v38, %v455_v37  ;;  %v723_v48 = vadd.f32 %v1675_v1, %v722_v39  ;;  %v385_v39 = vadd.f32 %v1977_v19, %v384_v9 }
 0x204   :  { %v1074_v42 = vpop.f32.mrf.mxu2 }
 0x205   :  { %v1075_v46 = vadd.f32 %v1816_v43, %v1074_v42  ;;  %1352 = vmatmul.msk.bf16.gmra.mxu1 %vm541_vm1, %v496_v40  ;;  %v837_v52 = vmax.f32 %v723_v48, 0.0  ;;  %v387_v40 = vadd.f32 %v1977_v19, %v386_v16 }
 0x206   :  { %v369_v47 = vpop.f32.mrf.mxu0 }
 0x207   :  { %1217 = vst.msk [vmem:[%s2288_s7 + $0x60] sm:$0xff] %vm1204_vm2, %v1075_v46  ;;  %v370_v53 = vadd.f32 %v1557_v34, %v369_v47  ;;  %v391_v47 = vpop.f32.mrf.mxu3 }
 0x209   :  { %v457_v44 = vmax.f32 %v370_v53, 0.0 }
 0x20a   :  { %v724_v49 = vpop.f32.mrf.mxu1 }
 0x20b   :  { %v725_v51 = vadd.f32 %v1675_v1, %v724_v49 }
 0x20c   :  { %v1076_v35 = vpop.f32.mrf.mxu2 }
 0x20d   :  { %v838_v41 = vmax.f32 %v725_v51, 0.0  ;;  %v1077_v54 = vadd.f32 %v1816_v43, %v1076_v35  ;;  %v463_v51 = vmax.f32 %v385_v39, 0.0  ;;  %v464_v35 = vmax.f32 %v387_v40, 0.0 }
 0x20e   :  { %v371_v55 = vpop.f32.mrf.mxu0 }
 0x20f   :  { %v886_v56 = vpack.c.bf16 %v838_v41, %v837_v52  ;;  %1218 = vst.msk [vmem:[%s2288_s7 + $0x68] sm:$0xff] %vm1204_vm2, %v1077_v54  ;;  %v372_v57 = vadd.f32 %v1557_v34, %v371_v55  ;;  %v498_v34 = vpack.c.bf16 %v460_v11, %v459_v10  ;;  %v500_v41 = vpack.c.bf16 %v464_v35, %v463_v51 }
 0x211   :  { %v458_v58 = vmax.f32 %v372_v57, 0.0  ;;  %1392 = vmatmul.msk.bf16.gmra.mxu2 %vm541_vm1, %v886_v56  ;;  %v394_v56 = vpop.f32.mrf.mxu3 }
 0x212   :  { %v727_v59 = vpop.f32.mrf.mxu1 }
 0x213   :  { %v497_v60 = vpack.c.bf16 %v458_v58, %v457_v44  ;;  %v728_v0 = vadd.f32 %v1675_v1, %v727_v59  ;;  %v390_v58 = vadd.f32 %v1977_v19, %v389_v31  ;;  %v392_v59 = vadd.f32 %v1977_v19, %v391_v47 }
 0x214   :  { %v1079_v61 = vpop.f32.mrf.mxu2 }
 0x215   :  { %v1080_v63 = vadd.f32 %v1816_v43, %v1079_v61  ;;  %1353 = vmatmul.msk.bf16.vlgmr.msrb.gmra.mxu3 %vm541_vm1, %v497_v60  ;;  %v839_v6 = vmax.f32 %v728_v0, 0.0  ;;  %v466_v45 = vmax.f32 %v392_v59, 0.0 }
 0x217   :  { %1219 = vst.msk [vmem:[%s2288_s7 + $0x70] sm:$0xff] %vm1204_vm2, %v1080_v63 }
 0x21a   :  { %v729_v2 = vpop.f32.mrf.mxu1 }
 0x21b   :  { %v730_v4 = vadd.f32 %v1675_v1, %v729_v2  ;;  %v465_v2 = vmax.f32 %v390_v58, 0.0 }
 0x21c   :  { %v1081_v5 = vpop.f32.mrf.mxu2 }
 0x21d   :  { %v840_v7 = vmax.f32 %v730_v4, 0.0  ;;  %v1082_v8 = vadd.f32 %v1816_v43, %v1081_v5  ;;  %v396_v4 = vpop.f32.mrf.mxu3 }
 0x21f   :  { %v887_v12 = vpack.c.bf16 %v840_v7, %v839_v6  ;;  %1220 = vst.msk [vmem:[%s2288_s7 + $0x78] sm:$0xff] %vm1204_vm2, %v1082_v8  ;;  %v501_v6 = vpack.c.bf16 %v466_v45, %v465_v2 }
 0x221   :  { %1393 = vmatmul.msk.bf16.gmra.mxu2 %vm541_vm1, %v887_v12  ;;  %v395_v12 = vadd.f32 %v1977_v19, %v394_v56 }
 0x222   :  { %v732_v13 = vpop.f32.mrf.mxu1 }
 0x223   :  { %v733_v17 = vadd.f32 %v1675_v1, %v732_v13  ;;  %v397_v13 = vadd.f32 %v1977_v19, %v396_v4 }
 0x224   :  { %v1084_v14 = vpop.f32.mrf.mxu2 }
 0x225   :  { %v1085_v15 = vadd.f32 %v1816_v43, %v1084_v14  ;;  %1354 = vmatmul.msk.bf16.gmra.mxu3 %vm541_vm1, %v498_v34  ;;  %v841_v24 = vmax.f32 %v733_v17, 0.0  ;;  %v399_v11 = vpop.f32.mrf.mxu3  ;;  %v468_v20 = vmax.f32 %v397_v13, 0.0 }
 0x227   :  { %1221 = vst.msk [vmem:[%s2288_s7 + $0x80] sm:$0xff] %vm1204_vm2, %v1085_v15 }
 0x22a   :  { %v734_v18 = vpop.f32.mrf.mxu1 }
 0x22b   :  { %v735_v22 = vadd.f32 %v1675_v1, %v734_v18  ;;  %v467_v18 = vmax.f32 %v395_v12, 0.0 }
 0x22c   :  { %v1086_v23 = vpop.f32.mrf.mxu2 }
 0x22d   :  { %v842_v25 = vmax.f32 %v735_v22, 0.0  ;;  %v1087_v26 = vadd.f32 %v1816_v43, %v1086_v23  ;;  %v502_v23 = vpack.c.bf16 %v468_v20, %v467_v18 }
 0x22f   :  { %v888_v29 = vpack.c.bf16 %v842_v25, %v841_v24  ;;  %1222 = vst.msk [vmem:[%s2288_s7 + $0x88] sm:$0xff] %vm1204_vm2, %v1087_v26  ;;  %v401_v25 = vpop.f32.mrf.mxu3 }
 0x231   :  { %1394 = vmatmul.msk.bf16.gmra.mxu2 %vm541_vm1, %v888_v29  ;;  %v400_v29 = vadd.f32 %v1977_v19, %v399_v11 }
 0x232   :  { %v737_v30 = vpop.f32.mrf.mxu1 }
 0x233   :  { %v738_v37 = vadd.f32 %v1675_v1, %v737_v30  ;;  %v402_v30 = vadd.f32 %v1977_v19, %v401_v25  ;;  %v469_v39 = vmax.f32 %v400_v29, 0.0 }
 0x234   :  { %v1089_v33 = vpop.f32.mrf.mxu2 }
 0x235   :  { %v1090_v36 = vadd.f32 %v1816_v43, %v1089_v33  ;;  %1355 = vmatmul.msk.bf16.gmra.mxu3 %vm541_vm1, %v499_v32  ;;  %v843_v48 = vmax.f32 %v738_v37, 0.0  ;;  %v470_v40 = vmax.f32 %v402_v30, 0.0 }
 0x237   :  { %1223 = vst.msk [vmem:[%s2288_s7 + $0x90] sm:$0xff] %vm1204_vm2, %v1090_v36  ;;  %v503_v47 = vpack.c.bf16 %v470_v40, %v469_v39 }
 0x23a   :  { %v739_v38 = vpop.f32.mrf.mxu1 }
 0x23b   :  { %v740_v42 = vadd.f32 %v1675_v1, %v739_v38  ;;  %v404_v38 = vpop.f32.mrf.mxu3 }
 0x23c   :  { %v1091_v46 = vpop.f32.mrf.mxu2 }
 0x23d   :  { %v844_v49 = vmax.f32 %v740_v42, 0.0  ;;  %v1092_v50 = vadd.f32 %v1816_v43, %v1091_v46 }
 0x23f   :  { %v889_v52 = vpack.c.bf16 %v844_v49, %v843_v48  ;;  %1224 = vst.msk [vmem:[%s2288_s7 + $0x98] sm:$0xff] %vm1204_vm2, %v1092_v50 }
 0x241   :  { %1395 = vmatmul.msk.bf16.gmra.mxu2 %vm541_vm1, %v889_v52  ;;  %v405_v52 = vadd.f32 %v1977_v19, %v404_v38 }
 0x242   :  { %v742_v53 = vpop.f32.mrf.mxu1 }
 0x243   :  { %v743_v57 = vadd.f32 %v1675_v1, %v742_v53  ;;  %v406_v50 = vpop.f32.mrf.mxu3 }
 0x244   :  { %v1094_v54 = vpop.f32.mrf.mxu2  ;;  %v407_v53 = vadd.f32 %v1977_v19, %v406_v50 }
 0x245   :  { %v1095_v55 = vadd.f32 %v1816_v43, %v1094_v54  ;;  %1356 = vmatmul.msk.bf16.gmra.mxu3 %vm541_vm1, %v500_v41  ;;  %v845_v62 = vmax.f32 %v743_v57, 0.0 }
 0x246   :  { %v472_v58 = vmax.f32 %v407_v53, 0.0 }
 0x247   :  { %1225 = vst.msk [vmem:[%s2288_s7 + $0xa0] sm:$0xff] %vm1204_vm2, %v1095_v55 }
 0x24a   :  { %v744_v44 = vpop.f32.mrf.mxu1 }
 0x24b   :  { %v745_v60 = vadd.f32 %v1675_v1, %v744_v44  ;;  %v471_v44 = vmax.f32 %v405_v52, 0.0 }
 0x24c   :  { %v1096_v61 = vpop.f32.mrf.mxu2 }
 0x24d   :  { %v846_v63 = vmax.f32 %v745_v60, 0.0  ;;  %v1097_v0 = vadd.f32 %v1816_v43, %v1096_v61  ;;  %v504_v61 = vpack.c.bf16 %v472_v58, %v471_v44 }
 0x24f   :  { %v890_v3 = vpack.c.bf16 %v846_v63, %v845_v62  ;;  %1226 = vst.msk [vmem:[%s2288_s7 + $0xa8] sm:$0xff] %vm1204_vm2, %v1097_v0  ;;  %v2077_v62 = vld [vmem:[%s2285_s4] ss:$0 sm:$0xff] }
 0x251   :  { %1396 = vmatmul.msk.bf16.gmra.mxu2 %vm541_vm1, %v890_v3 }
 0x252   :  { %v747_v5 = vpop.f32.mrf.mxu1 }
 0x253   :  { %v748_v9 = vadd.f32 %v1675_v1, %v747_v5 }
 0x254   :  { %v1099_v7 = vpop.f32.mrf.mxu2 }
 0x255   :  { %v1100_v8 = vadd.f32 %v1816_v43, %v1099_v7  ;;  %1357 = vmatmul.msk.bf16.gmra.mxu3 %vm541_vm1, %v501_v6  ;;  %v847_v15 = vmax.f32 %v748_v9, 0.0 }
 0x257   :  { %1227 = vst.msk [vmem:[%s2288_s7 + $0xb0] sm:$0xff] %vm1204_vm2, %v1100_v8 }
 0x25a   :  { %v749_v10 = vpop.f32.mrf.mxu1 }
 0x25b   :  { %v750_v34 = vadd.f32 %v1675_v1, %v749_v10 }
 0x25c   :  { %v1101_v14 = vpop.f32.mrf.mxu2 }
 0x25d   :  { %v848_v16 = vmax.f32 %v750_v34, 0.0  ;;  %v1102_v17 = vadd.f32 %v1816_v43, %v1101_v14 }
 0x25f   :  { %v891_v21 = vpack.c.bf16 %v848_v16, %v847_v15  ;;  %1228 = vst.msk [vmem:[%s2288_s7 + $0xb8] sm:$0xff] %vm1204_vm2, %v1102_v17 }
 0x261   :  { %1397 = vmatmul.msk.bf16.gmra.mxu2 %vm541_vm1, %v891_v21 }
 0x262   :  { %v752_v22 = vpop.f32.mrf.mxu1 }
 0x263   :  { %v753_v27 = vadd.f32 %v1675_v1, %v752_v22 }
 0x264   :  { %v1104_v24 = vpop.f32.mrf.mxu2 }
 0x265   :  { %v1105_v26 = vadd.f32 %v1816_v43, %v1104_v24  ;;  %1358 = vmatmul.msk.bf16.gmra.mxu3 %vm541_vm1, %v502_v23  ;;  %v849_v33 = vmax.f32 %v753_v27, 0.0 }
 0x267   :  { %1229 = vst.msk [vmem:[%s2288_s7 + $0xc0] sm:$0xff] %vm1204_vm2, %v1105_v26 }
 0x26a   :  { %v754_v28 = vpop.f32.mrf.mxu1 }
 0x26b   :  { %v755_v31 = vadd.f32 %v1675_v1, %v754_v28 }
 0x26c   :  { %v1106_v32 = vpop.f32.mrf.mxu2 }
 0x26d   :  { %v850_v36 = vmax.f32 %v755_v31, 0.0  ;;  %v1107_v37 = vadd.f32 %v1816_v43, %v1106_v32 }
 0x26f   :  { %v892_v42 = vpack.c.bf16 %v850_v36, %v849_v33  ;;  %1230 = vst.msk [vmem:[%s2288_s7 + $0xc8] sm:$0xff] %vm1204_vm2, %v1107_v37 }
 0x271   :  { %1398 = vmatmul.msk.bf16.gmra.mxu2 %vm541_vm1, %v892_v42 }
 0x272   :  { %v757_v46 = vpop.f32.mrf.mxu1 }
 0x273   :  { %v758_v51 = vadd.f32 %v1675_v1, %v757_v46 }
 0x274   :  { %v1109_v48 = vpop.f32.mrf.mxu2 }
 0x275   :  { %v1110_v49 = vadd.f32 %v1816_v43, %v1109_v48  ;;  %1359 = vmatmul.msk.bf16.gmra.mxu3 %vm541_vm1, %v503_v47  ;;  %v851_v55 = vmax.f32 %v758_v51, 0.0 }
 0x277   :  { %1231 = vst.msk [vmem:[%s2288_s7 + $0xd0] sm:$0xff] %vm1204_vm2, %v1110_v49 }
 0x27a   :  { %v759_v35 = vpop.f32.mrf.mxu1 }
 0x27b   :  { %v760_v41 = vadd.f32 %v1675_v1, %v759_v35 }
 0x27c   :  { %v1111_v54 = vpop.f32.mrf.mxu2 }
 0x27d   :  { %v852_v56 = vmax.f32 %v760_v41, 0.0  ;;  %v1112_v57 = vadd.f32 %v1816_v43, %v1111_v54 }
 0x27f   :  { %v893_v59 = vpack.c.bf16 %v852_v56, %v851_v55  ;;  %1232 = vst.msk [vmem:[%s2288_s7 + $0xd8] sm:$0xff] %vm1204_vm2, %v1112_v57 }
 0x281   :  { %1399 = vmatmul.msk.bf16.gmra.mxu2 %vm541_vm1, %v893_v59 }
 0x282   :  { %v762_v60 = vpop.f32.mrf.mxu1 }
 0x283   :  { %v763_v63 = vadd.f32 %v2077_v62, %v762_v60 }
 0x284   :  { %v1114_v19 = vpop.f32.mrf.mxu2 }
 0x285   :  { %v1115_v1 = vadd.f32 %v1816_v43, %v1114_v19  ;;  %1360 = vmatmul.msk.bf16.gmra.mxu3 %vm541_vm1, %v504_v61  ;;  %v853_v3 = vmax.f32 %v763_v63, 0.0 }
 0x287   :  { %1233 = vst.msk [vmem:[%s2288_s7 + $0xe0] sm:$0xff] %vm1204_vm2, %v1115_v1 }
 0x28a   :  { %v764_v0 = vpop.f32.mrf.mxu1 }
 0x28b   :  { %v765_v2 = vadd.f32 %v2077_v62, %v764_v0 }
 0x28c   :  { %v1116_v45 = vpop.f32.mrf.mxu2 }
 0x28d   :  { %v854_v4 = vmax.f32 %v765_v2, 0.0  ;;  %v1117_v5 = vadd.f32 %v1816_v43, %v1116_v45 }
 0x28f   :  { %v894_v6 = vpack.c.bf16 %v854_v4, %v853_v3  ;;  %1234 = vst.msk [vmem:[%s2288_s7 + $0xe8] sm:$0xff] %vm1204_vm2, %v1117_v5 }
 0x291   :  { %1400 = vmatmul.msk.bf16.gmra.mxu2 %vm541_vm1, %v894_v6 }
 0x294   :  { %v1119_v7 = vpop.f32.mrf.mxu2 }
 0x295   :  { %v1120_v8 = vadd.f32 %v1816_v43, %v1119_v7 }
 0x297   :  { %1235 = vst.msk [vmem:[%s2288_s7 + $0xf0] sm:$0xff] %vm1204_vm2, %v1120_v8 }
 0x298   :  { %v767_v9 = vpop.f32.mrf.mxu3 }
 0x299   :  { %v768_v12 = vadd.f32 %v2077_v62, %v767_v9 }
 0x29b   :  { %v855_v14 = vmax.f32 %v768_v12, 0.0 }
 0x29c   :  { %v1121_v10 = vpop.f32.mrf.mxu2 }
 0x29d   :  { %v1122_v11 = vadd.f32 %v1816_v43, %v1121_v10 }
 0x29f   :  { %1236 = vst.msk [vmem:[%s2288_s7 + $0xf8] sm:$0xff] %vm1204_vm2, %v1122_v11 }
 0x2a0   :  { %v769_v13 = vpop.f32.mrf.mxu3 }
 0x2a1   :  { %v770_v34 = vadd.f32 %v2077_v62, %v769_v13 }
 0x2a3   :  { %v856_v15 = vmax.f32 %v770_v34, 0.0 }
 0x2a4   :  { %v1124_v16 = vpop.f32.mrf.mxu2 }
 0x2a5   :  { %v895_v17 = vpack.c.bf16 %v856_v15, %v855_v14  ;;  %v1125_v18 = vadd.f32 %v1816_v43, %v1124_v16 }
 0x2a7   :  { %1237 = vst.msk [vmem:[%s2288_s7 + $0x100] sm:$0xff] %vm1204_vm2, %v1125_v18  ;;  %1401 = vmatmul.msk.bf16.vlgmr.msra.gmra.mxu3 %vm541_vm1, %v895_v17 }
 0x2a8   :  { %v772_v20 = vpop.f32.mrf.mxu3 }
 0x2a9   :  { %v773_v23 = vadd.f32 %v2077_v62, %v772_v20 }
 0x2ab   :  { %v857_v26 = vmax.f32 %v773_v23, 0.0 }
 0x2ac   :  { %v1126_v21 = vpop.f32.mrf.mxu2 }
 0x2ad   :  { %v1127_v22 = vadd.f32 %v1816_v43, %v1126_v21 }
 0x2af   :  { %1238 = vst.msk [vmem:[%s2288_s7 + $0x108] sm:$0xff] %vm1204_vm2, %v1127_v22 }
 0x2b0   :  { %v774_v24 = vpop.f32.mrf.mxu3 }
 0x2b1   :  { %v775_v25 = vadd.f32 %v2077_v62, %v774_v24 }
 0x2b3   :  { %v858_v27 = vmax.f32 %v775_v25, 0.0 }
 0x2b4   :  { %v1129_v28 = vpop.f32.mrf.mxu2 }
 0x2b5   :  { %v896_v29 = vpack.c.bf16 %v858_v27, %v857_v26  ;;  %v1130_v30 = vadd.f32 %v1816_v43, %v1129_v28 }
 0x2b7   :  { %1239 = vst.msk [vmem:[%s2288_s7 + $0x110] sm:$0xff] %vm1204_vm2, %v1130_v30  ;;  %1402 = vmatmul.msk.bf16.gmra.mxu3 %vm541_vm1, %v896_v29 }
 0x2b8   :  { %v777_v31 = vpop.f32.mrf.mxu3 }
 0x2b9   :  { %v778_v36 = vadd.f32 %v2077_v62, %v777_v31 }
 0x2bb   :  { %v859_v39 = vmax.f32 %v778_v36, 0.0 }
 0x2bc   :  { %v1131_v32 = vpop.f32.mrf.mxu2 }
 0x2bd   :  { %v1132_v33 = vadd.f32 %v1816_v43, %v1131_v32 }
 0x2bf   :  { %1240 = vst.msk [vmem:[%s2288_s7 + $0x118] sm:$0xff] %vm1204_vm2, %v1132_v33 }
 0x2c0   :  { %v779_v37 = vpop.f32.mrf.mxu3 }
 0x2c1   :  { %v780_v38 = vadd.f32 %v2077_v62, %v779_v37 }
 0x2c3   :  { %v860_v40 = vmax.f32 %v780_v38, 0.0 }
 0x2c4   :  { %v1134_v42 = vpop.f32.mrf.mxu2 }
 0x2c5   :  { %v897_v46 = vpack.c.bf16 %v860_v40, %v859_v39  ;;  %v1135_v47 = vadd.f32 %v1816_v43, %v1134_v42 }
 0x2c7   :  { %1241 = vst.msk [vmem:[%s2288_s7 + $0x120] sm:$0xff] %vm1204_vm2, %v1135_v47  ;;  %1403 = vmatmul.msk.bf16.gmra.mxu3 %vm541_vm1, %v897_v46 }
 0x2c8   :  { %v782_v48 = vpop.f32.mrf.mxu3 }
 0x2c9   :  { %v783_v51 = vadd.f32 %v2077_v62, %v782_v48 }
 0x2cb   :  { %v861_v53 = vmax.f32 %v783_v51, 0.0 }
 0x2cc   :  { %v1136_v49 = vpop.f32.mrf.mxu2 }
 0x2cd   :  { %v1137_v50 = vadd.f32 %v1816_v43, %v1136_v49 }
 0x2cf   :  { %1242 = vst.msk [vmem:[%s2288_s7 + $0x128] sm:$0xff] %vm1204_vm2, %v1137_v50 }
 0x2d0   :  { %v784_v35 = vpop.f32.mrf.mxu3 }
 0x2d1   :  { %v785_v52 = vadd.f32 %v2077_v62, %v784_v35 }
 0x2d3   :  { %v862_v41 = vmax.f32 %v785_v52, 0.0 }
 0x2d4   :  { %v1139_v54 = vpop.f32.mrf.mxu2 }
 0x2d5   :  { %v898_v55 = vpack.c.bf16 %v862_v41, %v861_v53  ;;  %v1140_v56 = vadd.f32 %v1816_v43, %v1139_v54 }
 0x2d7   :  { %1243 = vst.msk [vmem:[%s2288_s7 + $0x130] sm:$0xff] %vm1204_vm2, %v1140_v56  ;;  %1404 = vmatmul.msk.bf16.gmra.mxu3 %vm541_vm1, %v898_v55 }
 0x2d8   :  { %v787_v57 = vpop.f32.mrf.mxu3 }
 0x2d9   :  { %v788_v59 = vadd.f32 %v2077_v62, %v787_v57 }
 0x2db   :  { %v863_v19 = vmax.f32 %v788_v59, 0.0 }
 0x2dc   :  { %v1141_v44 = vpop.f32.mrf.mxu2 }
 0x2dd   :  { %v1142_v58 = vadd.f32 %v1816_v43, %v1141_v44 }
 0x2df   :  { %1244 = vst.msk [vmem:[%s2288_s7 + $0x138] sm:$0xff] %vm1204_vm2, %v1142_v58 }
 0x2e0   :  { %v789_v60 = vpop.f32.mrf.mxu3 }
 0x2e1   :  { %v790_v61 = vadd.f32 %v2077_v62, %v789_v60 }
 0x2e3   :  { %v864_v1 = vmax.f32 %v790_v61, 0.0 }
 0x2e4   :  { %v1144_v63 = vpop.f32.mrf.mxu2 }
 0x2e5   :  { %v899_v0 = vpack.c.bf16 %v864_v1, %v863_v19  ;;  %v1145_v2 = vadd.f32 %v1816_v43, %v1144_v63 }
 0x2e7   :  { %1245 = vst.msk [vmem:[%s2288_s7 + $0x140] sm:$0xff] %vm1204_vm2, %v1145_v2  ;;  %1405 = vmatmul.msk.bf16.gmra.mxu3 %vm541_vm1, %v899_v0 }
 0x2e8   :  { %v792_v45 = vpop.f32.mrf.mxu3 }
 0x2e9   :  { %v793_v5 = vadd.f32 %v2077_v62, %v792_v45 }
 0x2eb   :  { %v865_v8 = vmax.f32 %v793_v5, 0.0 }
 0x2ec   :  { %v1146_v3 = vpop.f32.mrf.mxu2 }
 0x2ed   :  { %v1147_v4 = vadd.f32 %v1816_v43, %v1146_v3 }
 0x2ef   :  { %1246 = vst.msk [vmem:[%s2288_s7 + $0x148] sm:$0xff] %vm1204_vm2, %v1147_v4 }
 0x2f0   :  { %v794_v6 = vpop.f32.mrf.mxu3 }
 0x2f1   :  { %v795_v7 = vadd.f32 %v2077_v62, %v794_v6 }
 0x2f3   :  { %v866_v9 = vmax.f32 %v795_v7, 0.0 }
 0x2f4   :  { %v1149_v10 = vpop.f32.mrf.mxu2 }
 0x2f5   :  { %v900_v11 = vpack.c.bf16 %v866_v9, %v865_v8  ;;  %v1150_v12 = vadd.f32 %v1816_v43, %v1149_v10 }
 0x2f7   :  { %1247 = vst.msk [vmem:[%s2288_s7 + $0x150] sm:$0xff] %vm1204_vm2, %v1150_v12  ;;  %1406 = vmatmul.msk.bf16.gmra.mxu3 %vm541_vm1, %v900_v11 }
 0x2f8   :  { %v797_v13 = vpop.f32.mrf.mxu3 }
 0x2f9   :  { %v798_v15 = vadd.f32 %v2077_v62, %v797_v13 }
 0x2fb   :  { %v867_v18 = vmax.f32 %v798_v15, 0.0 }
 0x2fc   :  { %v1151_v34 = vpop.f32.mrf.mxu2 }
 0x2fd   :  { %v1152_v14 = vadd.f32 %v1816_v43, %v1151_v34 }
 0x2ff   :  { %1248 = vst.msk [vmem:[%s2288_s7 + $0x158] sm:$0xff] %vm1204_vm2, %v1152_v14 }
 0x300   :  { %v799_v16 = vpop.f32.mrf.mxu3 }
 0x301   :  { %v800_v17 = vadd.f32 %v2077_v62, %v799_v16 }
 0x303   :  { %v868_v20 = vmax.f32 %v800_v17, 0.0 }
 0x304   :  { %v1154_v21 = vpop.f32.mrf.mxu2 }
 0x305   :  { %v901_v22 = vpack.c.bf16 %v868_v20, %v867_v18  ;;  %v1155_v23 = vadd.f32 %v1816_v43, %v1154_v21 }
 0x307   :  { %1249 = vst.msk [vmem:[%s2288_s7 + $0x160] sm:$0xff] %vm1204_vm2, %v1155_v23  ;;  %1407 = vmatmul.msk.bf16.gmra.mxu3 %vm541_vm1, %v901_v22 }
 0x308   :  { %v802_v24 = vpop.f32.mrf.mxu3 }
 0x309   :  { %v803_v27 = vadd.f32 %v2077_v62, %v802_v24 }
 0x30b   :  { %v869_v30 = vmax.f32 %v803_v27, 0.0 }
 0x30c   :  { %v1156_v25 = vpop.f32.mrf.mxu2 }
 0x30d   :  { %v1157_v26 = vadd.f32 %v1816_v43, %v1156_v25 }
 0x30f   :  { %1250 = vst.msk [vmem:[%s2288_s7 + $0x168] sm:$0xff] %vm1204_vm2, %v1157_v26 }
 0x310   :  { %v804_v28 = vpop.f32.mrf.mxu3 }
 0x311   :  { %v805_v29 = vadd.f32 %v2077_v62, %v804_v28 }
 0x313   :  { %v870_v31 = vmax.f32 %v805_v29, 0.0 }
 0x314   :  { %v1159_v32 = vpop.f32.mrf.mxu2 }
 0x315   :  { %v902_v33 = vpack.c.bf16 %v870_v31, %v869_v30  ;;  %v1160_v36 = vadd.f32 %v1816_v43, %v1159_v32 }
 0x317   :  { %1251 = vst.msk [vmem:[%s2288_s7 + $0x170] sm:$0xff] %vm1204_vm2, %v1160_v36  ;;  %1408 = vmatmul.msk.bf16.gmra.mxu3 %vm541_vm1, %v902_v33 }
 0x31c   :  { %v1161_v37 = vpop.f32.mrf.mxu2 }
 0x31d   :  { %v1162_v38 = vadd.f32 %v1816_v43, %v1161_v37 }
 0x31f   :  { %1252 = vst.msk [vmem:[%s2288_s7 + $0x178] sm:$0xff] %vm1204_vm2, %v1162_v38 }
 0x32a   :  { %v1164_v62 = vpop.f32.mrf.mxu3 }
 0x32b   :  { %v1165_v39 = vadd.f32 %v1816_v43, %v1164_v62 }
 0x32d   :  { %1253 = vst.msk [vmem:[%s2288_s7 + $0x180] sm:$0xff] %vm1204_vm2, %v1165_v39 }
 0x332   :  { %v1166_v40 = vpop.f32.mrf.mxu3 }
 0x333   :  { %v1167_v42 = vadd.f32 %v1816_v43, %v1166_v40 }
 0x335   :  { %1254 = vst.msk [vmem:[%s2288_s7 + $0x188] sm:$0xff] %vm1204_vm2, %v1167_v42 }
 0x33a   :  { %v1169_v46 = vpop.f32.mrf.mxu3 }
 0x33b   :  { %v1170_v47 = vadd.f32 %v1816_v43, %v1169_v46 }
 0x33d   :  { %1255 = vst.msk [vmem:[%s2288_s7 + $0x190] sm:$0xff] %vm1204_vm2, %v1170_v47 }
 0x342   :  { %v1171_v48 = vpop.f32.mrf.mxu3 }
 0x343   :  { %v1172_v49 = vadd.f32 %v1816_v43, %v1171_v48 }
 0x345   :  { %1256 = vst.msk [vmem:[%s2288_s7 + $0x198] sm:$0xff] %vm1204_vm2, %v1172_v49 }
 0x34a   :  { %v1174_v50 = vpop.f32.mrf.mxu3 }
 0x34b   :  { %v1175_v51 = vadd.f32 %v1816_v43, %v1174_v50 }
 0x34d   :  { %1257 = vst.msk [vmem:[%s2288_s7 + $0x1a0] sm:$0xff] %vm1204_vm2, %v1175_v51 }
 0x352   :  { %v1176_v35 = vpop.f32.mrf.mxu3 }
 0x353   :  { %v1177_v52 = vadd.f32 %v1816_v43, %v1176_v35 }
 0x355   :  { %1258 = vst.msk [vmem:[%s2288_s7 + $0x1a8] sm:$0xff] %vm1204_vm2, %v1177_v52 }
 0x35a   :  { %v1179_v53 = vpop.f32.mrf.mxu3 }
 0x35b   :  { %v1180_v41 = vadd.f32 %v1816_v43, %v1179_v53 }
 0x35d   :  { %1259 = vst.msk [vmem:[%s2288_s7 + $0x1b0] sm:$0xff] %vm1204_vm2, %v1180_v41 }
 0x362   :  { %v1181_v54 = vpop.f32.mrf.mxu3 }
 0x363   :  { %v1182_v55 = vadd.f32 %v1816_v43, %v1181_v54 }
 0x365   :  { %1260 = vst.msk [vmem:[%s2288_s7 + $0x1b8] sm:$0xff] %vm1204_vm2, %v1182_v55 }
 0x36a   :  { %v1184_v56 = vpop.f32.mrf.mxu3 }
 0x36b   :  { %v1185_v57 = vadd.f32 %v1816_v43, %v1184_v56 }
 0x36d   :  { %1261 = vst.msk [vmem:[%s2288_s7 + $0x1c0] sm:$0xff] %vm1204_vm2, %v1185_v57 }
 0x372   :  { %v1186_v44 = vpop.f32.mrf.mxu3 }
 0x373   :  { %v1187_v58 = vadd.f32 %v1816_v43, %v1186_v44 }
 0x375   :  { %1262 = vst.msk [vmem:[%s2288_s7 + $0x1c8] sm:$0xff] %vm1204_vm2, %v1187_v58 }
 0x37a   :  { %v1189_v59 = vpop.f32.mrf.mxu3 }
 0x37b   :  { %v1190_v60 = vadd.f32 %v1816_v43, %v1189_v59 }
 0x37d   :  { %1263 = vst.msk [vmem:[%s2288_s7 + $0x1d0] sm:$0xff] %vm1204_vm2, %v1190_v60 }
 0x382   :  { %v1191_v61 = vpop.f32.mrf.mxu3 }
 0x383   :  { %v1192_v19 = vadd.f32 %v1816_v43, %v1191_v61 }
 0x385   :  { %1264 = vst.msk [vmem:[%s2288_s7 + $0x1d8] sm:$0xff] %vm1204_vm2, %v1192_v19 }
 0x38a   :  { %v1194_v1 = vpop.f32.mrf.mxu3 }
 0x38b   :  { %v1195_v63 = vadd.f32 %v1816_v43, %v1194_v1 }
 0x38d   :  { %1265 = vst.msk [vmem:[%s2288_s7 + $0x1e0] sm:$0xff] %vm1204_vm2, %v1195_v63 }
 0x392   :  { %v1196_v0 = vpop.f32.mrf.mxu3 }
 0x393   :  { %v1197_v2 = vadd.f32 %v1816_v43, %v1196_v0 }
 0x395   :  { %1266 = vst.msk [vmem:[%s2288_s7 + $0x1e8] sm:$0xff] %vm1204_vm2, %v1197_v2 }
 0x39a   :  { %v1199_v45 = vpop.f32.mrf.mxu3 }
 0x39b   :  { %v1200_v3 = vadd.f32 %v1816_v43, %v1199_v45 }
 0x39d   :  { %1267 = vst.msk [vmem:[%s2288_s7 + $0x1f0] sm:$0xff] %vm1204_vm2, %v1200_v3 }
 0x3a2   :  { %v1201_v4 = vpop.f32.mrf.mxu3 }
 0x3a3   :  { %v1202_v5 = vadd.f32 %v1816_v43, %v1201_v4 }
 0x3a5   :  { %1268 = vst.msk [vmem:[%s2288_s7 + $0x1f8] sm:$0xff] %vm1204_vm2, %v1202_v5 }

</bundles_post_ra>
